<compile_context>
chip_gen: v5e
topology: v5e:2x2
jax: 0.10.0
libtpu: 0.0.40
codegen_flags: <defaults>
</compile_context>

<pallas_src>
import functools

import jax
import jax.numpy as jnp
from jax.experimental import pallas as pl
from jax.experimental.pallas import tpu as pltpu


# ----------------------------------------------------------------------------
# Fused Pallas kernel: N-layer LSTM + last-timestep select + dense + sigmoid
# ----------------------------------------------------------------------------
def _fused_lstm_kernel(len_ref, x_ref, *refs, num_layers, hidden, seq_len, batch):
    """in_refs : len (B,1) i32, x (T*B, E) f32, then per layer
                 (w_ih_t (E_in,4H), w_hh_t (H,4H), bias (1,4H)),
                 then w_dense (1,H), b_dense (1,1).
       out_ref : (B, 1) f32
       scratch : gx (T*B, 4H) f32  (reused/ping-ponged in place across layers)
    """
    H = hidden
    n = num_layers
    wd_ref = refs[3 * n]
    bd_ref = refs[3 * n + 1]
    out_ref = refs[3 * n + 2]
    gx_scr = refs[3 * n + 3]

    # Hoisted: lengths broadcast (JAX does not CSE broadcast_in_dim per step).
    lens_b = jnp.broadcast_to(len_ref[...], (batch, H))     # (B, H) int32
    zero = jnp.zeros((batch, H), jnp.float32)
    h_sel = zero

    # Layer-0 hoisted input projection: one big MXU matmul (bias folded in),
    # off the serial recurrence chain.
    gx_scr[...] = (
        jnp.dot(x_ref[...], refs[0][...], preferred_element_type=jnp.float32)
        + refs[2][...]
    )

    for l in range(n):
        whh = refs[3 * l + 1][...]                           # (H, 4H), loaded once
        is_last = l == n - 1
        if not is_last:
            wih_next = refs[3 * (l + 1)][...]                # (H, 4H)
            b_next = refs[3 * (l + 1) + 2][...]              # (1, 4H)

        # Time recurrence, fully unrolled at trace time; h/c stay in vregs.
        # Per step only one (B,H)x(H,4H) matmul + 2 EUP pushes are on the chain.
        h = zero
        c = zero
        for t in range(seq_len):
            row = t * batch
            gates = gx_scr[row:row + batch, :] + jnp.dot(
                h, whh, preferred_element_type=jnp.float32)  # (B, 4H)

            # One sigmoid + one tanh over the full (B,4H) vreg, then lane-slice.
            sig_all = jax.nn.sigmoid(gates)
            tanh_all = jnp.tanh(gates)
            i_g = sig_all[:, 0 * H:1 * H]
            f_g = sig_all[:, 1 * H:2 * H]
            g_g = tanh_all[:, 2 * H:3 * H]
            o_g = sig_all[:, 3 * H:4 * H]

            c = f_g * c + i_g * g_g
            h = o_g * jnp.tanh(c)

            if is_last:
                # In-kernel last-valid-timestep selection (t == lengths - 1).
                h_sel = jnp.where(lens_b == (t + 1), h, h_sel)
            else:
                # Interleaved next-layer input projection: overwrite the gx row
                # just consumed with layer (l+1)'s gates_x for this timestep.
                # MXU is otherwise idle during the per-step gate chain.
                gx_scr[row:row + batch, :] = (
                    jnp.dot(h, wih_next, preferred_element_type=jnp.float32)
                    + b_next
                )

    # Fused dense + sigmoid head: lane-friendly VPU multiply + lane reduction
    # (avoids a wasted (H,1) MXU pass).
    logits = jnp.sum(h_sel * wd_ref[...], axis=1, keepdims=True) + bd_ref[...]
    out_ref[...] = jax.nn.sigmoid(logits)


def fused_lstm_head(lengths_col, x2d, lstm_params, w_dense, b_dense, *,
                    seq_len, batch):
    """lengths_col: (B,1) i32. x2d: (T*B, E) f32 (row = t*B + b)."""
    H = lstm_params[0]["w_hh_t"].shape[0]
    n = len(lstm_params)

    inputs = [lengths_col, x2d]
    in_specs = [
        pl.BlockSpec(lengths_col.shape, lambda i: (0, 0)),
        pl.BlockSpec(x2d.shape, lambda i: (0, 0)),
    ]
    for layer in lstm_params:
        inputs += [layer["w_ih_t"], layer["w_hh_t"], layer["bias"]]
        in_specs += [
            pl.BlockSpec(layer["w_ih_t"].shape, lambda i: (0, 0)),
            pl.BlockSpec(layer["w_hh_t"].shape, lambda i: (0, 0)),
            pl.BlockSpec(layer["bias"].shape, lambda i: (0, 0)),
        ]
    inputs += [w_dense, b_dense]
    in_specs += [
        pl.BlockSpec(w_dense.shape, lambda i: (0, 0)),
        pl.BlockSpec(b_dense.shape, lambda i: (0, 0)),
    ]

    kernel = functools.partial(
        _fused_lstm_kernel, num_layers=n, hidden=H, seq_len=seq_len, batch=batch)

    return pl.pallas_call(
        kernel,
        out_shape=jax.ShapeDtypeStruct((batch, 1), jnp.float32),
        grid_spec=pltpu.PrefetchScalarGridSpec(
            num_scalar_prefetch=0,
            grid=(1,),                       # single step: no per-step pipeline overhead
            in_specs=in_specs,
            out_specs=pl.BlockSpec((batch, 1), lambda i: (0, 0)),
            scratch_shapes=[
                pltpu.VMEM((seq_len * batch, 4 * H), jnp.float32),  # gates_x (in-place reuse)
            ],
        ),
        compiler_params=pltpu.CompilerParams(dimension_semantics=("arbitrary",)),
    )(*inputs)


# ----------------------------------------------------------------------------
# Model wrapper (glue in plain JAX: embedding gather, reshapes)
# ----------------------------------------------------------------------------
def lstm_classifier_forward(params, x):
    """x: (B, T+1) int32.  Mirrors LSTMClassifierNew.forward (eval mode)."""
    x_t = x.T                                   # (T+1, B)
    lengths = x_t[0, :].astype(jnp.int32)       # (B,)
    reviews = x_t[1:, :]                        # (T, B)

    # Embedding lookup stays in XLA (padding_idx=0 row is zeros in the table).
    embeds = jnp.take(params["embedding"], reviews, axis=0)   # (T, B, E) f32
    T, B, E = embeds.shape

    x2d = embeds.reshape(T * B, E)              # time-major rows: row = t*B + b
    lengths_col = lengths.reshape(B, 1)

    out = fused_lstm_head(lengths_col, x2d, params["lstm"],
                          params["w_dense"], params["b_dense"],
                          seq_len=T, batch=B)   # (B, 1)
    return jnp.squeeze(out)                     # (B,)


# ----------------------------------------------------------------------------
# Deterministic parameter init (shapes per LSTMClassifierNew.__init__)
# ----------------------------------------------------------------------------
def init_params(key, vocab_size, embedding_dim, hidden_dim, layers):
    ks = jax.random.split(key, 3 + 4 * layers)
    k_emb, k_dw, k_db = ks[0], ks[1], ks[2]
    k_lstm = ks[3:]

    emb = jax.random.normal(k_emb, (vocab_size, embedding_dim), jnp.float32)
    emb = emb.at[0].set(0.0)  # padding_idx=0

    bound = 1.0 / jnp.sqrt(hidden_dim)
    lstm_layers = []
    for l in range(layers):
        e_in = embedding_dim if l == 0 else hidden_dim
        kw0, kw1, kb0, kb1 = k_lstm[4 * l: 4 * l + 4]
        w_ih = jax.random.uniform(kw0, (4 * hidden_dim, e_in), jnp.float32, -bound, bound)
        w_hh = jax.random.uniform(kw1, (4 * hidden_dim, hidden_dim), jnp.float32, -bound, bound)
        b_ih = jax.random.uniform(kb0, (4 * hidden_dim,), jnp.float32, -bound, bound)
        b_hh = jax.random.uniform(kb1, (4 * hidden_dim,), jnp.float32, -bound, bound)
        lstm_layers.append({
            "w_ih_t": w_ih.T,                                  # (E_in, 4H)
            "w_hh_t": w_hh.T,                                  # (H, 4H)
            "bias": (b_ih + b_hh).reshape(1, 4 * hidden_dim),  # (1, 4H)
        })

    d_bound = 1.0 / jnp.sqrt(hidden_dim)
    w_dense = jax.random.uniform(k_dw, (1, hidden_dim), jnp.float32, -d_bound, d_bound)
    b_dense = jax.random.uniform(k_db, (1,), jnp.float32, -d_bound, d_bound)

    return {
        "embedding": emb,
        "lstm": lstm_layers,
        "w_dense": w_dense,                 # (1, H) — used as a VPU row vector
        "b_dense": b_dense.reshape(1, 1),   # (1, 1)
    }


# ----------------------------------------------------------------------------
# Pure-JAX reference (correctness check of the Pallas path)
# ----------------------------------------------------------------------------
def reference_forward(params, x):
    x_t = x.T
    lengths = x_t[0, :]
    reviews = x_t[1:, :]
    embeds = jnp.take(params["embedding"], reviews, axis=0)
    T, B, _ = embeds.shape

    h_in = embeds
    for layer in params["lstm"]:
        H = layer["w_hh_t"].shape[0]

        def step(carry, x_t_):
            h, c = carry
            gates = x_t_ @ layer["w_ih_t"] + h @ layer["w_hh_t"] + layer["bias"]
            i = jax.nn.sigmoid(gates[:, 0 * H:1 * H])
            f = jax.nn.sigmoid(gates[:, 1 * H:2 * H])
            g = jnp.tanh(gates[:, 2 * H:3 * H])
            o = jax.nn.sigmoid(gates[:, 3 * H:4 * H])
            c = f * c + i * g
            h = o * jnp.tanh(c)
            return (h, c), h

        init = (jnp.zeros((B, H), jnp.float32), jnp.zeros((B, H), jnp.float32))
        _, h_in = jax.lax.scan(step, init, h_in)

    h_sel = h_in[lengths - 1, jnp.arange(B)]
    out = jax.nn.sigmoid(h_sel @ params["w_dense"].T + params["b_dense"])
    return jnp.squeeze(out)


if __name__ == "__main__":
    # Small, module-consistent shapes.
    embedding_dim, hidden_dim, vocab_size, layers = 16, 32, 50, 2
    B, T = 8, 8

    key = jax.random.PRNGKey(0)
    k_params, k_tok, k_len = jax.random.split(key, 3)

    params = init_params(k_params, vocab_size, embedding_dim, hidden_dim, layers)

    tokens = jax.random.randint(k_tok, (B, T), 0, vocab_size, dtype=jnp.int32)
    lengths = jax.random.randint(k_len, (B, 1), 1, T + 1, dtype=jnp.int32)
    x = jnp.concatenate([lengths, tokens], axis=1)  # (B, T+1): col 0 = length

    out = jax.jit(lstm_classifier_forward)(params, x)
    out = jax.block_until_ready(out)

    ref = reference_forward(params, x)
    assert out.shape == (B,)
    assert jnp.allclose(out, ref, rtol=1e-4, atol=1e-5), (out, ref)

    print("KERNEL_OK")
</pallas_src>

<mosaic_0001>
module attributes {stable_mosaic.version = 11 : i64} {
  func.func @_fused_lstm_kernel(%arg0: i32, %arg1: memref<8x1xi32, #tpu.memory_space<vmem>>, %arg2: memref<64x16xf32, #tpu.memory_space<vmem>>, %arg3: memref<16x128xf32, #tpu.memory_space<vmem>>, %arg4: memref<32x128xf32, #tpu.memory_space<vmem>>, %arg5: memref<1x128xf32, #tpu.memory_space<vmem>>, %arg6: memref<32x128xf32, #tpu.memory_space<vmem>>, %arg7: memref<32x128xf32, #tpu.memory_space<vmem>>, %arg8: memref<1x128xf32, #tpu.memory_space<vmem>>, %arg9: memref<1x32xf32, #tpu.memory_space<vmem>>, %arg10: memref<1x1xf32, #tpu.memory_space<vmem>>, %arg11: memref<8x1xf32, #tpu.memory_space<vmem>>, %arg12: memref<64x128xf32, #tpu.memory_space<vmem>>) attributes {dimension_semantics = [#tpu.dimension_semantics<arbitrary>], iteration_bounds = array<i64: 1>, scalar_prefetch = 0 : i64, scratch_operands = 1 : i64, tpu.core_type = #tpu.core_type<tc>, window_params = [{pipeline_mode = #tpu.pipeline_mode<synchronous>, transform_indices = @transform_0, window_bounds = array<i64: 8, 1>}, {pipeline_mode = #tpu.pipeline_mode<synchronous>, transform_indices = @transform_1, window_bounds = array<i64: 64, 16>}, {pipeline_mode = #tpu.pipeline_mode<synchronous>, transform_indices = @transform_2, window_bounds = array<i64: 16, 128>}, {pipeline_mode = #tpu.pipeline_mode<synchronous>, transform_indices = @transform_3, window_bounds = array<i64: 32, 128>}, {pipeline_mode = #tpu.pipeline_mode<synchronous>, transform_indices = @transform_4, window_bounds = array<i64: 1, 128>}, {pipeline_mode = #tpu.pipeline_mode<synchronous>, transform_indices = @transform_5, window_bounds = array<i64: 32, 128>}, {pipeline_mode = #tpu.pipeline_mode<synchronous>, transform_indices = @transform_6, window_bounds = array<i64: 32, 128>}, {pipeline_mode = #tpu.pipeline_mode<synchronous>, transform_indices = @transform_7, window_bounds = array<i64: 1, 128>}, {pipeline_mode = #tpu.pipeline_mode<synchronous>, transform_indices = @transform_8, window_bounds = array<i64: 1, 32>}, {pipeline_mode = #tpu.pipeline_mode<synchronous>, transform_indices = @transform_9, window_bounds = array<i64: 1, 1>}, {pipeline_mode = #tpu.pipeline_mode<synchronous>, transform_indices = @transform_10, window_bounds = array<i64: 8, 1>}]} {
    %c0 = arith.constant 0 : index
    %c0_0 = arith.constant 0 : index
    %0 = vector.load %arg1[%c0, %c0_0] : memref<8x1xi32, #tpu.memory_space<vmem>>, vector<8x1xi32>
    %1 = vector.shape_cast %0 : vector<8x1xi32> to vector<8x1xi32>
    %2 = vector.broadcast %1 : vector<8x1xi32> to vector<8x32xi32>
    %cst = arith.constant 0.000000e+00 : f32
    %3 = vector.broadcast %cst : f32 to vector<8x32xf32>
    %c0_1 = arith.constant 0 : index
    %c0_2 = arith.constant 0 : index
    %4 = vector.load %arg2[%c0_1, %c0_2] : memref<64x16xf32, #tpu.memory_space<vmem>>, vector<64x16xf32>
    %c0_3 = arith.constant 0 : index
    %c0_4 = arith.constant 0 : index
    %5 = vector.load %arg3[%c0_3, %c0_4] : memref<16x128xf32, #tpu.memory_space<vmem>>, vector<16x128xf32>
    %cst_5 = arith.constant dense<0.000000e+00> : vector<64x128xf32>
    %6 = tpu.matmul %4, %5, %cst_5 {dimension_numbers = #tpu.dot_dimension_numbers<[1], [0], [0], [1], [0, 0, 1, 1], [], []>} : vector<64x16xf32>, vector<16x128xf32>, vector<64x128xf32> -> vector<64x128xf32>
    %c0_6 = arith.constant 0 : index
    %c0_7 = arith.constant 0 : index
    %7 = vector.load %arg5[%c0_6, %c0_7] : memref<1x128xf32, #tpu.memory_space<vmem>>, vector<1x128xf32>
    %8 = vector.broadcast %7 : vector<1x128xf32> to vector<64x128xf32>
    %9 = arith.addf %6, %8 : vector<64x128xf32>
    %c0_8 = arith.constant 0 : index
    %c0_9 = arith.constant 0 : index
    %10 = vector.load %arg12[%c0_8, %c0_9] : memref<64x128xf32, #tpu.memory_space<vmem>>, vector<64x128xf32>
    tpu.vector_store %arg12[%c0_8, %c0_9], %9 {strides = array<i32>} : memref<64x128xf32, #tpu.memory_space<vmem>>, vector<64x128xf32>,
    %c0_10 = arith.constant 0 : index
    %c0_11 = arith.constant 0 : index
    %11 = vector.load %arg4[%c0_10, %c0_11] : memref<32x128xf32, #tpu.memory_space<vmem>>, vector<32x128xf32>
    %c0_12 = arith.constant 0 : index
    %c0_13 = arith.constant 0 : index
    %12 = vector.load %arg6[%c0_12, %c0_13] : memref<32x128xf32, #tpu.memory_space<vmem>>, vector<32x128xf32>
    %c0_14 = arith.constant 0 : index
    %c0_15 = arith.constant 0 : index
    %13 = vector.load %arg8[%c0_14, %c0_15] : memref<1x128xf32, #tpu.memory_space<vmem>>, vector<1x128xf32>
    %c0_16 = arith.constant 0 : index
    %c0_17 = arith.constant 0 : index
    %14 = vector.load %arg12[%c0_16, %c0_17] : memref<64x128xf32, #tpu.memory_space<vmem>>, vector<8x128xf32>
    %cst_18 = arith.constant dense<0.000000e+00> : vector<8x128xf32>
    %15 = tpu.matmul %3, %11, %cst_18 {dimension_numbers = #tpu.dot_dimension_numbers<[1], [0], [0], [1], [0, 0, 1, 1], [], []>} : vector<8x32xf32>, vector<32x128xf32>, vector<8x128xf32> -> vector<8x128xf32>
    %16 = arith.addf %14, %15 : vector<8x128xf32>
    %17 = arith.negf %16 : vector<8x128xf32>
    %18 = math.exp %17 : vector<8x128xf32>
    %cst_19 = arith.constant 1.000000e+00 : f32
    %19 = vector.broadcast %cst_19 : f32 to vector<8x128xf32>
    %20 = arith.addf %19, %18 : vector<8x128xf32>
    %21 = arith.divf %19, %20 : vector<8x128xf32>
    %22 = math.tanh %16 : vector<8x128xf32>
    %23 = vector.extract_strided_slice %21 {offsets = [0, 0], sizes = [8, 32], strides = [1, 1]} : vector<8x128xf32> to vector<8x32xf32>
    %24 = vector.extract_strided_slice %21 {offsets = [0, 32], sizes = [8, 32], strides = [1, 1]} : vector<8x128xf32> to vector<8x32xf32>
    %25 = vector.extract_strided_slice %22 {offsets = [0, 64], sizes = [8, 32], strides = [1, 1]} : vector<8x128xf32> to vector<8x32xf32>
    %26 = vector.extract_strided_slice %21 {offsets = [0, 96], sizes = [8, 32], strides = [1, 1]} : vector<8x128xf32> to vector<8x32xf32>
    %27 = arith.mulf %24, %3 : vector<8x32xf32>
    %28 = arith.mulf %23, %25 : vector<8x32xf32>
    %29 = arith.addf %27, %28 : vector<8x32xf32>
    %30 = math.tanh %29 : vector<8x32xf32>
    %31 = arith.mulf %26, %30 : vector<8x32xf32>
    %cst_20 = arith.constant dense<0.000000e+00> : vector<8x128xf32>
    %32 = tpu.matmul %31, %12, %cst_20 {dimension_numbers = #tpu.dot_dimension_numbers<[1], [0], [0], [1], [0, 0, 1, 1], [], []>} : vector<8x32xf32>, vector<32x128xf32>, vector<8x128xf32> -> vector<8x128xf32>
    %33 = vector.broadcast %13 : vector<1x128xf32> to vector<8x128xf32>
    %34 = arith.addf %32, %33 : vector<8x128xf32>
    %c0_21 = arith.constant 0 : index
    %c0_22 = arith.constant 0 : index
    %35 = vector.load %arg12[%c0_21, %c0_22] : memref<64x128xf32, #tpu.memory_space<vmem>>, vector<8x128xf32>
    tpu.vector_store %arg12[%c0_21, %c0_22], %34 {strides = array<i32>} : memref<64x128xf32, #tpu.memory_space<vmem>>, vector<8x128xf32>,
    %c8 = arith.constant 8 : index
    %c0_23 = arith.constant 0 : index
    %36 = vector.load %arg12[%c8, %c0_23] : memref<64x128xf32, #tpu.memory_space<vmem>>, vector<8x128xf32>
    %cst_24 = arith.constant dense<0.000000e+00> : vector<8x128xf32>
    %37 = tpu.matmul %31, %11, %cst_24 {dimension_numbers = #tpu.dot_dimension_numbers<[1], [0], [0], [1], [0, 0, 1, 1], [], []>} : vector<8x32xf32>, vector<32x128xf32>, vector<8x128xf32> -> vector<8x128xf32>
    %38 = arith.addf %36, %37 : vector<8x128xf32>
    %39 = arith.negf %38 : vector<8x128xf32>
    %40 = math.exp %39 : vector<8x128xf32>
    %cst_25 = arith.constant 1.000000e+00 : f32
    %41 = vector.broadcast %cst_25 : f32 to vector<8x128xf32>
    %42 = arith.addf %41, %40 : vector<8x128xf32>
    %43 = arith.divf %41, %42 : vector<8x128xf32>
    %44 = math.tanh %38 : vector<8x128xf32>
    %45 = vector.extract_strided_slice %43 {offsets = [0, 0], sizes = [8, 32], strides = [1, 1]} : vector<8x128xf32> to vector<8x32xf32>
    %46 = vector.extract_strided_slice %43 {offsets = [0, 32], sizes = [8, 32], strides = [1, 1]} : vector<8x128xf32> to vector<8x32xf32>
    %47 = vector.extract_strided_slice %44 {offsets = [0, 64], sizes = [8, 32], strides = [1, 1]} : vector<8x128xf32> to vector<8x32xf32>
    %48 = vector.extract_strided_slice %43 {offsets = [0, 96], sizes = [8, 32], strides = [1, 1]} : vector<8x128xf32> to vector<8x32xf32>
    %49 = arith.mulf %46, %29 : vector<8x32xf32>
    %50 = arith.mulf %45, %47 : vector<8x32xf32>
    %51 = arith.addf %49, %50 : vector<8x32xf32>
    %52 = math.tanh %51 : vector<8x32xf32>
    %53 = arith.mulf %48, %52 : vector<8x32xf32>
    %cst_26 = arith.constant dense<0.000000e+00> : vector<8x128xf32>
    %54 = tpu.matmul %53, %12, %cst_26 {dimension_numbers = #tpu.dot_dimension_numbers<[1], [0], [0], [1], [0, 0, 1, 1], [], []>} : vector<8x32xf32>, vector<32x128xf32>, vector<8x128xf32> -> vector<8x128xf32>
    %55 = vector.broadcast %13 : vector<1x128xf32> to vector<8x128xf32>
    %56 = arith.addf %54, %55 : vector<8x128xf32>
    %c8_27 = arith.constant 8 : index
    %c0_28 = arith.constant 0 : index
    %57 = vector.load %arg12[%c8_27, %c0_28] : memref<64x128xf32, #tpu.memory_space<vmem>>, vector<8x128xf32>
    tpu.vector_store %arg12[%c8_27, %c0_28], %56 {strides = array<i32>} : memref<64x128xf32, #tpu.memory_space<vmem>>, vector<8x128xf32>,
    %c16 = arith.constant 16 : index
    %c0_29 = arith.constant 0 : index
    %58 = vector.load %arg12[%c16, %c0_29] : memref<64x128xf32, #tpu.memory_space<vmem>>, vector<8x128xf32>
    %cst_30 = arith.constant dense<0.000000e+00> : vector<8x128xf32>
    %59 = tpu.matmul %53, %11, %cst_30 {dimension_numbers = #tpu.dot_dimension_numbers<[1], [0], [0], [1], [0, 0, 1, 1], [], []>} : vector<8x32xf32>, vector<32x128xf32>, vector<8x128xf32> -> vector<8x128xf32>
    %60 = arith.addf %58, %59 : vector<8x128xf32>
    %61 = arith.negf %60 : vector<8x128xf32>
    %62 = math.exp %61 : vector<8x128xf32>
    %cst_31 = arith.constant 1.000000e+00 : f32
    %63 = vector.broadcast %cst_31 : f32 to vector<8x128xf32>
    %64 = arith.addf %63, %62 : vector<8x128xf32>
    %65 = arith.divf %63, %64 : vector<8x128xf32>
    %66 = math.tanh %60 : vector<8x128xf32>
    %67 = vector.extract_strided_slice %65 {offsets = [0, 0], sizes = [8, 32], strides = [1, 1]} : vector<8x128xf32> to vector<8x32xf32>
    %68 = vector.extract_strided_slice %65 {offsets = [0, 32], sizes = [8, 32], strides = [1, 1]} : vector<8x128xf32> to vector<8x32xf32>
    %69 = vector.extract_strided_slice %66 {offsets = [0, 64], sizes = [8, 32], strides = [1, 1]} : vector<8x128xf32> to vector<8x32xf32>
    %70 = vector.extract_strided_slice %65 {offsets = [0, 96], sizes = [8, 32], strides = [1, 1]} : vector<8x128xf32> to vector<8x32xf32>
    %71 = arith.mulf %68, %51 : vector<8x32xf32>
    %72 = arith.mulf %67, %69 : vector<8x32xf32>
    %73 = arith.addf %71, %72 : vector<8x32xf32>
    %74 = math.tanh %73 : vector<8x32xf32>
    %75 = arith.mulf %70, %74 : vector<8x32xf32>
    %cst_32 = arith.constant dense<0.000000e+00> : vector<8x128xf32>
    %76 = tpu.matmul %75, %12, %cst_32 {dimension_numbers = #tpu.dot_dimension_numbers<[1], [0], [0], [1], [0, 0, 1, 1], [], []>} : vector<8x32xf32>, vector<32x128xf32>, vector<8x128xf32> -> vector<8x128xf32>
    %77 = vector.broadcast %13 : vector<1x128xf32> to vector<8x128xf32>
    %78 = arith.addf %76, %77 : vector<8x128xf32>
    %c16_33 = arith.constant 16 : index
    %c0_34 = arith.constant 0 : index
    %79 = vector.load %arg12[%c16_33, %c0_34] : memref<64x128xf32, #tpu.memory_space<vmem>>, vector<8x128xf32>
    tpu.vector_store %arg12[%c16_33, %c0_34], %78 {strides = array<i32>} : memref<64x128xf32, #tpu.memory_space<vmem>>, vector<8x128xf32>,
    %c24 = arith.constant 24 : index
    %c0_35 = arith.constant 0 : index
    %80 = vector.load %arg12[%c24, %c0_35] : memref<64x128xf32, #tpu.memory_space<vmem>>, vector<8x128xf32>
    %cst_36 = arith.constant dense<0.000000e+00> : vector<8x128xf32>
    %81 = tpu.matmul %75, %11, %cst_36 {dimension_numbers = #tpu.dot_dimension_numbers<[1], [0], [0], [1], [0, 0, 1, 1], [], []>} : vector<8x32xf32>, vector<32x128xf32>, vector<8x128xf32> -> vector<8x128xf32>
    %82 = arith.addf %80, %81 : vector<8x128xf32>
    %83 = arith.negf %82 : vector<8x128xf32>
    %84 = math.exp %83 : vector<8x128xf32>
    %cst_37 = arith.constant 1.000000e+00 : f32
    %85 = vector.broadcast %cst_37 : f32 to vector<8x128xf32>
    %86 = arith.addf %85, %84 : vector<8x128xf32>
    %87 = arith.divf %85, %86 : vector<8x128xf32>
    %88 = math.tanh %82 : vector<8x128xf32>
    %89 = vector.extract_strided_slice %87 {offsets = [0, 0], sizes = [8, 32], strides = [1, 1]} : vector<8x128xf32> to vector<8x32xf32>
    %90 = vector.extract_strided_slice %87 {offsets = [0, 32], sizes = [8, 32], strides = [1, 1]} : vector<8x128xf32> to vector<8x32xf32>
    %91 = vector.extract_strided_slice %88 {offsets = [0, 64], sizes = [8, 32], strides = [1, 1]} : vector<8x128xf32> to vector<8x32xf32>
    %92 = vector.extract_strided_slice %87 {offsets = [0, 96], sizes = [8, 32], strides = [1, 1]} : vector<8x128xf32> to vector<8x32xf32>
    %93 = arith.mulf %90, %73 : vector<8x32xf32>
    %94 = arith.mulf %89, %91 : vector<8x32xf32>
    %95 = arith.addf %93, %94 : vector<8x32xf32>
    %96 = math.tanh %95 : vector<8x32xf32>
    %97 = arith.mulf %92, %96 : vector<8x32xf32>
    %cst_38 = arith.constant dense<0.000000e+00> : vector<8x128xf32>
    %98 = tpu.matmul %97, %12, %cst_38 {dimension_numbers = #tpu.dot_dimension_numbers<[1], [0], [0], [1], [0, 0, 1, 1], [], []>} : vector<8x32xf32>, vector<32x128xf32>, vector<8x128xf32> -> vector<8x128xf32>
    %99 = vector.broadcast %13 : vector<1x128xf32> to vector<8x128xf32>
    %100 = arith.addf %98, %99 : vector<8x128xf32>
    %c24_39 = arith.constant 24 : index
    %c0_40 = arith.constant 0 : index
    %101 = vector.load %arg12[%c24_39, %c0_40] : memref<64x128xf32, #tpu.memory_space<vmem>>, vector<8x128xf32>
    tpu.vector_store %arg12[%c24_39, %c0_40], %100 {strides = array<i32>} : memref<64x128xf32, #tpu.memory_space<vmem>>, vector<8x128xf32>,
    %c32 = arith.constant 32 : index
    %c0_41 = arith.constant 0 : index
    %102 = vector.load %arg12[%c32, %c0_41] : memref<64x128xf32, #tpu.memory_space<vmem>>, vector<8x128xf32>
    %cst_42 = arith.constant dense<0.000000e+00> : vector<8x128xf32>
    %103 = tpu.matmul %97, %11, %cst_42 {dimension_numbers = #tpu.dot_dimension_numbers<[1], [0], [0], [1], [0, 0, 1, 1], [], []>} : vector<8x32xf32>, vector<32x128xf32>, vector<8x128xf32> -> vector<8x128xf32>
    %104 = arith.addf %102, %103 : vector<8x128xf32>
    %105 = arith.negf %104 : vector<8x128xf32>
    %106 = math.exp %105 : vector<8x128xf32>
    %cst_43 = arith.constant 1.000000e+00 : f32
    %107 = vector.broadcast %cst_43 : f32 to vector<8x128xf32>
    %108 = arith.addf %107, %106 : vector<8x128xf32>
    %109 = arith.divf %107, %108 : vector<8x128xf32>
    %110 = math.tanh %104 : vector<8x128xf32>
    %111 = vector.extract_strided_slice %109 {offsets = [0, 0], sizes = [8, 32], strides = [1, 1]} : vector<8x128xf32> to vector<8x32xf32>
    %112 = vector.extract_strided_slice %109 {offsets = [0, 32], sizes = [8, 32], strides = [1, 1]} : vector<8x128xf32> to vector<8x32xf32>
    %113 = vector.extract_strided_slice %110 {offsets = [0, 64], sizes = [8, 32], strides = [1, 1]} : vector<8x128xf32> to vector<8x32xf32>
    %114 = vector.extract_strided_slice %109 {offsets = [0, 96], sizes = [8, 32], strides = [1, 1]} : vector<8x128xf32> to vector<8x32xf32>
    %115 = arith.mulf %112, %95 : vector<8x32xf32>
    %116 = arith.mulf %111, %113 : vector<8x32xf32>
    %117 = arith.addf %115, %116 : vector<8x32xf32>
    %118 = math.tanh %117 : vector<8x32xf32>
    %119 = arith.mulf %114, %118 : vector<8x32xf32>
    %cst_44 = arith.constant dense<0.000000e+00> : vector<8x128xf32>
    %120 = tpu.matmul %119, %12, %cst_44 {dimension_numbers = #tpu.dot_dimension_numbers<[1], [0], [0], [1], [0, 0, 1, 1], [], []>} : vector<8x32xf32>, vector<32x128xf32>, vector<8x128xf32> -> vector<8x128xf32>
    %121 = vector.broadcast %13 : vector<1x128xf32> to vector<8x128xf32>
    %122 = arith.addf %120, %121 : vector<8x128xf32>
    %c32_45 = arith.constant 32 : index
    %c0_46 = arith.constant 0 : index
    %123 = vector.load %arg12[%c32_45, %c0_46] : memref<64x128xf32, #tpu.memory_space<vmem>>, vector<8x128xf32>
    tpu.vector_store %arg12[%c32_45, %c0_46], %122 {strides = array<i32>} : memref<64x128xf32, #tpu.memory_space<vmem>>, vector<8x128xf32>,
    %c40 = arith.constant 40 : index
    %c0_47 = arith.constant 0 : index
    %124 = vector.load %arg12[%c40, %c0_47] : memref<64x128xf32, #tpu.memory_space<vmem>>, vector<8x128xf32>
    %cst_48 = arith.constant dense<0.000000e+00> : vector<8x128xf32>
    %125 = tpu.matmul %119, %11, %cst_48 {dimension_numbers = #tpu.dot_dimension_numbers<[1], [0], [0], [1], [0, 0, 1, 1], [], []>} : vector<8x32xf32>, vector<32x128xf32>, vector<8x128xf32> -> vector<8x128xf32>
    %126 = arith.addf %124, %125 : vector<8x128xf32>
    %127 = arith.negf %126 : vector<8x128xf32>
    %128 = math.exp %127 : vector<8x128xf32>
    %cst_49 = arith.constant 1.000000e+00 : f32
    %129 = vector.broadcast %cst_49 : f32 to vector<8x128xf32>
    %130 = arith.addf %129, %128 : vector<8x128xf32>
    %131 = arith.divf %129, %130 : vector<8x128xf32>
    %132 = math.tanh %126 : vector<8x128xf32>
    %133 = vector.extract_strided_slice %131 {offsets = [0, 0], sizes = [8, 32], strides = [1, 1]} : vector<8x128xf32> to vector<8x32xf32>
    %134 = vector.extract_strided_slice %131 {offsets = [0, 32], sizes = [8, 32], strides = [1, 1]} : vector<8x128xf32> to vector<8x32xf32>
    %135 = vector.extract_strided_slice %132 {offsets = [0, 64], sizes = [8, 32], strides = [1, 1]} : vector<8x128xf32> to vector<8x32xf32>
    %136 = vector.extract_strided_slice %131 {offsets = [0, 96], sizes = [8, 32], strides = [1, 1]} : vector<8x128xf32> to vector<8x32xf32>
    %137 = arith.mulf %134, %117 : vector<8x32xf32>
    %138 = arith.mulf %133, %135 : vector<8x32xf32>
    %139 = arith.addf %137, %138 : vector<8x32xf32>
    %140 = math.tanh %139 : vector<8x32xf32>
    %141 = arith.mulf %136, %140 : vector<8x32xf32>
    %cst_50 = arith.constant dense<0.000000e+00> : vector<8x128xf32>
    %142 = tpu.matmul %141, %12, %cst_50 {dimension_numbers = #tpu.dot_dimension_numbers<[1], [0], [0], [1], [0, 0, 1, 1], [], []>} : vector<8x32xf32>, vector<32x128xf32>, vector<8x128xf32> -> vector<8x128xf32>
    %143 = vector.broadcast %13 : vector<1x128xf32> to vector<8x128xf32>
    %144 = arith.addf %142, %143 : vector<8x128xf32>
    %c40_51 = arith.constant 40 : index
    %c0_52 = arith.constant 0 : index
    %145 = vector.load %arg12[%c40_51, %c0_52] : memref<64x128xf32, #tpu.memory_space<vmem>>, vector<8x128xf32>
    tpu.vector_store %arg12[%c40_51, %c0_52], %144 {strides = array<i32>} : memref<64x128xf32, #tpu.memory_space<vmem>>, vector<8x128xf32>,
    %c48 = arith.constant 48 : index
    %c0_53 = arith.constant 0 : index
    %146 = vector.load %arg12[%c48, %c0_53] : memref<64x128xf32, #tpu.memory_space<vmem>>, vector<8x128xf32>
    %cst_54 = arith.constant dense<0.000000e+00> : vector<8x128xf32>
    %147 = tpu.matmul %141, %11, %cst_54 {dimension_numbers = #tpu.dot_dimension_numbers<[1], [0], [0], [1], [0, 0, 1, 1], [], []>} : vector<8x32xf32>, vector<32x128xf32>, vector<8x128xf32> -> vector<8x128xf32>
    %148 = arith.addf %146, %147 : vector<8x128xf32>
    %149 = arith.negf %148 : vector<8x128xf32>
    %150 = math.exp %149 : vector<8x128xf32>
    %cst_55 = arith.constant 1.000000e+00 : f32
    %151 = vector.broadcast %cst_55 : f32 to vector<8x128xf32>
    %152 = arith.addf %151, %150 : vector<8x128xf32>
    %153 = arith.divf %151, %152 : vector<8x128xf32>
    %154 = math.tanh %148 : vector<8x128xf32>
    %155 = vector.extract_strided_slice %153 {offsets = [0, 0], sizes = [8, 32], strides = [1, 1]} : vector<8x128xf32> to vector<8x32xf32>
    %156 = vector.extract_strided_slice %153 {offsets = [0, 32], sizes = [8, 32], strides = [1, 1]} : vector<8x128xf32> to vector<8x32xf32>
    %157 = vector.extract_strided_slice %154 {offsets = [0, 64], sizes = [8, 32], strides = [1, 1]} : vector<8x128xf32> to vector<8x32xf32>
    %158 = vector.extract_strided_slice %153 {offsets = [0, 96], sizes = [8, 32], strides = [1, 1]} : vector<8x128xf32> to vector<8x32xf32>
    %159 = arith.mulf %156, %139 : vector<8x32xf32>
    %160 = arith.mulf %155, %157 : vector<8x32xf32>
    %161 = arith.addf %159, %160 : vector<8x32xf32>
    %162 = math.tanh %161 : vector<8x32xf32>
    %163 = arith.mulf %158, %162 : vector<8x32xf32>
    %cst_56 = arith.constant dense<0.000000e+00> : vector<8x128xf32>
    %164 = tpu.matmul %163, %12, %cst_56 {dimension_numbers = #tpu.dot_dimension_numbers<[1], [0], [0], [1], [0, 0, 1, 1], [], []>} : vector<8x32xf32>, vector<32x128xf32>, vector<8x128xf32> -> vector<8x128xf32>
    %165 = vector.broadcast %13 : vector<1x128xf32> to vector<8x128xf32>
    %166 = arith.addf %164, %165 : vector<8x128xf32>
    %c48_57 = arith.constant 48 : index
    %c0_58 = arith.constant 0 : index
    %167 = vector.load %arg12[%c48_57, %c0_58] : memref<64x128xf32, #tpu.memory_space<vmem>>, vector<8x128xf32>
    tpu.vector_store %arg12[%c48_57, %c0_58], %166 {strides = array<i32>} : memref<64x128xf32, #tpu.memory_space<vmem>>, vector<8x128xf32>,
    %c56 = arith.constant 56 : index
    %c0_59 = arith.constant 0 : index
    %168 = vector.load %arg12[%c56, %c0_59] : memref<64x128xf32, #tpu.memory_space<vmem>>, vector<8x128xf32>
    %cst_60 = arith.constant dense<0.000000e+00> : vector<8x128xf32>
    %169 = tpu.matmul %163, %11, %cst_60 {dimension_numbers = #tpu.dot_dimension_numbers<[1], [0], [0], [1], [0, 0, 1, 1], [], []>} : vector<8x32xf32>, vector<32x128xf32>, vector<8x128xf32> -> vector<8x128xf32>
    %170 = arith.addf %168, %169 : vector<8x128xf32>
    %171 = arith.negf %170 : vector<8x128xf32>
    %172 = math.exp %171 : vector<8x128xf32>
    %cst_61 = arith.constant 1.000000e+00 : f32
    %173 = vector.broadcast %cst_61 : f32 to vector<8x128xf32>
    %174 = arith.addf %173, %172 : vector<8x128xf32>
    %175 = arith.divf %173, %174 : vector<8x128xf32>
    %176 = math.tanh %170 : vector<8x128xf32>
    %177 = vector.extract_strided_slice %175 {offsets = [0, 0], sizes = [8, 32], strides = [1, 1]} : vector<8x128xf32> to vector<8x32xf32>
    %178 = vector.extract_strided_slice %175 {offsets = [0, 32], sizes = [8, 32], strides = [1, 1]} : vector<8x128xf32> to vector<8x32xf32>
    %179 = vector.extract_strided_slice %176 {offsets = [0, 64], sizes = [8, 32], strides = [1, 1]} : vector<8x128xf32> to vector<8x32xf32>
    %180 = vector.extract_strided_slice %175 {offsets = [0, 96], sizes = [8, 32], strides = [1, 1]} : vector<8x128xf32> to vector<8x32xf32>
    %181 = arith.mulf %178, %161 : vector<8x32xf32>
    %182 = arith.mulf %177, %179 : vector<8x32xf32>
    %183 = arith.addf %181, %182 : vector<8x32xf32>
    %184 = math.tanh %183 : vector<8x32xf32>
    %185 = arith.mulf %180, %184 : vector<8x32xf32>
    %cst_62 = arith.constant dense<0.000000e+00> : vector<8x128xf32>
    %186 = tpu.matmul %185, %12, %cst_62 {dimension_numbers = #tpu.dot_dimension_numbers<[1], [0], [0], [1], [0, 0, 1, 1], [], []>} : vector<8x32xf32>, vector<32x128xf32>, vector<8x128xf32> -> vector<8x128xf32>
    %187 = vector.broadcast %13 : vector<1x128xf32> to vector<8x128xf32>
    %188 = arith.addf %186, %187 : vector<8x128xf32>
    %c56_63 = arith.constant 56 : index
    %c0_64 = arith.constant 0 : index
    %189 = vector.load %arg12[%c56_63, %c0_64] : memref<64x128xf32, #tpu.memory_space<vmem>>, vector<8x128xf32>
    tpu.vector_store %arg12[%c56_63, %c0_64], %188 {strides = array<i32>} : memref<64x128xf32, #tpu.memory_space<vmem>>, vector<8x128xf32>,
    %c0_65 = arith.constant 0 : index
    %c0_66 = arith.constant 0 : index
    %190 = vector.load %arg7[%c0_65, %c0_66] : memref<32x128xf32, #tpu.memory_space<vmem>>, vector<32x128xf32>
    %c0_67 = arith.constant 0 : index
    %c0_68 = arith.constant 0 : index
    %191 = vector.load %arg12[%c0_67, %c0_68] : memref<64x128xf32, #tpu.memory_space<vmem>>, vector<8x128xf32>
    %cst_69 = arith.constant dense<0.000000e+00> : vector<8x128xf32>
    %192 = tpu.matmul %3, %190, %cst_69 {dimension_numbers = #tpu.dot_dimension_numbers<[1], [0], [0], [1], [0, 0, 1, 1], [], []>} : vector<8x32xf32>, vector<32x128xf32>, vector<8x128xf32> -> vector<8x128xf32>
    %193 = arith.addf %191, %192 : vector<8x128xf32>
    %194 = arith.negf %193 : vector<8x128xf32>
    %195 = math.exp %194 : vector<8x128xf32>
    %cst_70 = arith.constant 1.000000e+00 : f32
    %196 = vector.broadcast %cst_70 : f32 to vector<8x128xf32>
    %197 = arith.addf %196, %195 : vector<8x128xf32>
    %198 = arith.divf %196, %197 : vector<8x128xf32>
    %199 = math.tanh %193 : vector<8x128xf32>
    %200 = vector.extract_strided_slice %198 {offsets = [0, 0], sizes = [8, 32], strides = [1, 1]} : vector<8x128xf32> to vector<8x32xf32>
    %201 = vector.extract_strided_slice %198 {offsets = [0, 32], sizes = [8, 32], strides = [1, 1]} : vector<8x128xf32> to vector<8x32xf32>
    %202 = vector.extract_strided_slice %199 {offsets = [0, 64], sizes = [8, 32], strides = [1, 1]} : vector<8x128xf32> to vector<8x32xf32>
    %203 = vector.extract_strided_slice %198 {offsets = [0, 96], sizes = [8, 32], strides = [1, 1]} : vector<8x128xf32> to vector<8x32xf32>
    %204 = arith.mulf %201, %3 : vector<8x32xf32>
    %205 = arith.mulf %200, %202 : vector<8x32xf32>
    %206 = arith.addf %204, %205 : vector<8x32xf32>
    %207 = math.tanh %206 : vector<8x32xf32>
    %208 = arith.mulf %203, %207 : vector<8x32xf32>
    %c1_i32 = arith.constant 1 : i32
    %209 = vector.broadcast %c1_i32 : i32 to vector<8x32xi32>
    %210 = arith.cmpi eq, %2, %209 : vector<8x32xi32>
    %211 = arith.select %210, %208, %3 : vector<8x32xi1>, vector<8x32xf32>
    %c8_71 = arith.constant 8 : index
    %c0_72 = arith.constant 0 : index
    %212 = vector.load %arg12[%c8_71, %c0_72] : memref<64x128xf32, #tpu.memory_space<vmem>>, vector<8x128xf32>
    %cst_73 = arith.constant dense<0.000000e+00> : vector<8x128xf32>
    %213 = tpu.matmul %208, %190, %cst_73 {dimension_numbers = #tpu.dot_dimension_numbers<[1], [0], [0], [1], [0, 0, 1, 1], [], []>} : vector<8x32xf32>, vector<32x128xf32>, vector<8x128xf32> -> vector<8x128xf32>
    %214 = arith.addf %212, %213 : vector<8x128xf32>
    %215 = arith.negf %214 : vector<8x128xf32>
    %216 = math.exp %215 : vector<8x128xf32>
    %cst_74 = arith.constant 1.000000e+00 : f32
    %217 = vector.broadcast %cst_74 : f32 to vector<8x128xf32>
    %218 = arith.addf %217, %216 : vector<8x128xf32>
    %219 = arith.divf %217, %218 : vector<8x128xf32>
    %220 = math.tanh %214 : vector<8x128xf32>
    %221 = vector.extract_strided_slice %219 {offsets = [0, 0], sizes = [8, 32], strides = [1, 1]} : vector<8x128xf32> to vector<8x32xf32>
    %222 = vector.extract_strided_slice %219 {offsets = [0, 32], sizes = [8, 32], strides = [1, 1]} : vector<8x128xf32> to vector<8x32xf32>
    %223 = vector.extract_strided_slice %220 {offsets = [0, 64], sizes = [8, 32], strides = [1, 1]} : vector<8x128xf32> to vector<8x32xf32>
    %224 = vector.extract_strided_slice %219 {offsets = [0, 96], sizes = [8, 32], strides = [1, 1]} : vector<8x128xf32> to vector<8x32xf32>
    %225 = arith.mulf %222, %206 : vector<8x32xf32>
    %226 = arith.mulf %221, %223 : vector<8x32xf32>
    %227 = arith.addf %225, %226 : vector<8x32xf32>
    %228 = math.tanh %227 : vector<8x32xf32>
    %229 = arith.mulf %224, %228 : vector<8x32xf32>
    %c2_i32 = arith.constant 2 : i32
    %230 = vector.broadcast %c2_i32 : i32 to vector<8x32xi32>
    %231 = arith.cmpi eq, %2, %230 : vector<8x32xi32>
    %232 = arith.select %231, %229, %211 : vector<8x32xi1>, vector<8x32xf32>
    %c16_75 = arith.constant 16 : index
    %c0_76 = arith.constant 0 : index
    %233 = vector.load %arg12[%c16_75, %c0_76] : memref<64x128xf32, #tpu.memory_space<vmem>>, vector<8x128xf32>
    %cst_77 = arith.constant dense<0.000000e+00> : vector<8x128xf32>
    %234 = tpu.matmul %229, %190, %cst_77 {dimension_numbers = #tpu.dot_dimension_numbers<[1], [0], [0], [1], [0, 0, 1, 1], [], []>} : vector<8x32xf32>, vector<32x128xf32>, vector<8x128xf32> -> vector<8x128xf32>
    %235 = arith.addf %233, %234 : vector<8x128xf32>
    %236 = arith.negf %235 : vector<8x128xf32>
    %237 = math.exp %236 : vector<8x128xf32>
    %cst_78 = arith.constant 1.000000e+00 : f32
    %238 = vector.broadcast %cst_78 : f32 to vector<8x128xf32>
    %239 = arith.addf %238, %237 : vector<8x128xf32>
    %240 = arith.divf %238, %239 : vector<8x128xf32>
    %241 = math.tanh %235 : vector<8x128xf32>
    %242 = vector.extract_strided_slice %240 {offsets = [0, 0], sizes = [8, 32], strides = [1, 1]} : vector<8x128xf32> to vector<8x32xf32>
    %243 = vector.extract_strided_slice %240 {offsets = [0, 32], sizes = [8, 32], strides = [1, 1]} : vector<8x128xf32> to vector<8x32xf32>
    %244 = vector.extract_strided_slice %241 {offsets = [0, 64], sizes = [8, 32], strides = [1, 1]} : vector<8x128xf32> to vector<8x32xf32>
    %245 = vector.extract_strided_slice %240 {offsets = [0, 96], sizes = [8, 32], strides = [1, 1]} : vector<8x128xf32> to vector<8x32xf32>
    %246 = arith.mulf %243, %227 : vector<8x32xf32>
    %247 = arith.mulf %242, %244 : vector<8x32xf32>
    %248 = arith.addf %246, %247 : vector<8x32xf32>
    %249 = math.tanh %248 : vector<8x32xf32>
    %250 = arith.mulf %245, %249 : vector<8x32xf32>
    %c3_i32 = arith.constant 3 : i32
    %251 = vector.broadcast %c3_i32 : i32 to vector<8x32xi32>
    %252 = arith.cmpi eq, %2, %251 : vector<8x32xi32>
    %253 = arith.select %252, %250, %232 : vector<8x32xi1>, vector<8x32xf32>
    %c24_79 = arith.constant 24 : index
    %c0_80 = arith.constant 0 : index
    %254 = vector.load %arg12[%c24_79, %c0_80] : memref<64x128xf32, #tpu.memory_space<vmem>>, vector<8x128xf32>
    %cst_81 = arith.constant dense<0.000000e+00> : vector<8x128xf32>
    %255 = tpu.matmul %250, %190, %cst_81 {dimension_numbers = #tpu.dot_dimension_numbers<[1], [0], [0], [1], [0, 0, 1, 1], [], []>} : vector<8x32xf32>, vector<32x128xf32>, vector<8x128xf32> -> vector<8x128xf32>
    %256 = arith.addf %254, %255 : vector<8x128xf32>
    %257 = arith.negf %256 : vector<8x128xf32>
    %258 = math.exp %257 : vector<8x128xf32>
    %cst_82 = arith.constant 1.000000e+00 : f32
    %259 = vector.broadcast %cst_82 : f32 to vector<8x128xf32>
    %260 = arith.addf %259, %258 : vector<8x128xf32>
    %261 = arith.divf %259, %260 : vector<8x128xf32>
    %262 = math.tanh %256 : vector<8x128xf32>
    %263 = vector.extract_strided_slice %261 {offsets = [0, 0], sizes = [8, 32], strides = [1, 1]} : vector<8x128xf32> to vector<8x32xf32>
    %264 = vector.extract_strided_slice %261 {offsets = [0, 32], sizes = [8, 32], strides = [1, 1]} : vector<8x128xf32> to vector<8x32xf32>
    %265 = vector.extract_strided_slice %262 {offsets = [0, 64], sizes = [8, 32], strides = [1, 1]} : vector<8x128xf32> to vector<8x32xf32>
    %266 = vector.extract_strided_slice %261 {offsets = [0, 96], sizes = [8, 32], strides = [1, 1]} : vector<8x128xf32> to vector<8x32xf32>
    %267 = arith.mulf %264, %248 : vector<8x32xf32>
    %268 = arith.mulf %263, %265 : vector<8x32xf32>
    %269 = arith.addf %267, %268 : vector<8x32xf32>
    %270 = math.tanh %269 : vector<8x32xf32>
    %271 = arith.mulf %266, %270 : vector<8x32xf32>
    %c4_i32 = arith.constant 4 : i32
    %272 = vector.broadcast %c4_i32 : i32 to vector<8x32xi32>
    %273 = arith.cmpi eq, %2, %272 : vector<8x32xi32>
    %274 = arith.select %273, %271, %253 : vector<8x32xi1>, vector<8x32xf32>
    %c32_83 = arith.constant 32 : index
    %c0_84 = arith.constant 0 : index
    %275 = vector.load %arg12[%c32_83, %c0_84] : memref<64x128xf32, #tpu.memory_space<vmem>>, vector<8x128xf32>
    %cst_85 = arith.constant dense<0.000000e+00> : vector<8x128xf32>
    %276 = tpu.matmul %271, %190, %cst_85 {dimension_numbers = #tpu.dot_dimension_numbers<[1], [0], [0], [1], [0, 0, 1, 1], [], []>} : vector<8x32xf32>, vector<32x128xf32>, vector<8x128xf32> -> vector<8x128xf32>
    %277 = arith.addf %275, %276 : vector<8x128xf32>
    %278 = arith.negf %277 : vector<8x128xf32>
    %279 = math.exp %278 : vector<8x128xf32>
    %cst_86 = arith.constant 1.000000e+00 : f32
    %280 = vector.broadcast %cst_86 : f32 to vector<8x128xf32>
    %281 = arith.addf %280, %279 : vector<8x128xf32>
    %282 = arith.divf %280, %281 : vector<8x128xf32>
    %283 = math.tanh %277 : vector<8x128xf32>
    %284 = vector.extract_strided_slice %282 {offsets = [0, 0], sizes = [8, 32], strides = [1, 1]} : vector<8x128xf32> to vector<8x32xf32>
    %285 = vector.extract_strided_slice %282 {offsets = [0, 32], sizes = [8, 32], strides = [1, 1]} : vector<8x128xf32> to vector<8x32xf32>
    %286 = vector.extract_strided_slice %283 {offsets = [0, 64], sizes = [8, 32], strides = [1, 1]} : vector<8x128xf32> to vector<8x32xf32>
    %287 = vector.extract_strided_slice %282 {offsets = [0, 96], sizes = [8, 32], strides = [1, 1]} : vector<8x128xf32> to vector<8x32xf32>
    %288 = arith.mulf %285, %269 : vector<8x32xf32>
    %289 = arith.mulf %284, %286 : vector<8x32xf32>
    %290 = arith.addf %288, %289 : vector<8x32xf32>
    %291 = math.tanh %290 : vector<8x32xf32>
    %292 = arith.mulf %287, %291 : vector<8x32xf32>
    %c5_i32 = arith.constant 5 : i32
    %293 = vector.broadcast %c5_i32 : i32 to vector<8x32xi32>
    %294 = arith.cmpi eq, %2, %293 : vector<8x32xi32>
    %295 = arith.select %294, %292, %274 : vector<8x32xi1>, vector<8x32xf32>
    %c40_87 = arith.constant 40 : index
    %c0_88 = arith.constant 0 : index
    %296 = vector.load %arg12[%c40_87, %c0_88] : memref<64x128xf32, #tpu.memory_space<vmem>>, vector<8x128xf32>
    %cst_89 = arith.constant dense<0.000000e+00> : vector<8x128xf32>
    %297 = tpu.matmul %292, %190, %cst_89 {dimension_numbers = #tpu.dot_dimension_numbers<[1], [0], [0], [1], [0, 0, 1, 1], [], []>} : vector<8x32xf32>, vector<32x128xf32>, vector<8x128xf32> -> vector<8x128xf32>
    %298 = arith.addf %296, %297 : vector<8x128xf32>
    %299 = arith.negf %298 : vector<8x128xf32>
    %300 = math.exp %299 : vector<8x128xf32>
    %cst_90 = arith.constant 1.000000e+00 : f32
    %301 = vector.broadcast %cst_90 : f32 to vector<8x128xf32>
    %302 = arith.addf %301, %300 : vector<8x128xf32>
    %303 = arith.divf %301, %302 : vector<8x128xf32>
    %304 = math.tanh %298 : vector<8x128xf32>
    %305 = vector.extract_strided_slice %303 {offsets = [0, 0], sizes = [8, 32], strides = [1, 1]} : vector<8x128xf32> to vector<8x32xf32>
    %306 = vector.extract_strided_slice %303 {offsets = [0, 32], sizes = [8, 32], strides = [1, 1]} : vector<8x128xf32> to vector<8x32xf32>
    %307 = vector.extract_strided_slice %304 {offsets = [0, 64], sizes = [8, 32], strides = [1, 1]} : vector<8x128xf32> to vector<8x32xf32>
    %308 = vector.extract_strided_slice %303 {offsets = [0, 96], sizes = [8, 32], strides = [1, 1]} : vector<8x128xf32> to vector<8x32xf32>
    %309 = arith.mulf %306, %290 : vector<8x32xf32>
    %310 = arith.mulf %305, %307 : vector<8x32xf32>
    %311 = arith.addf %309, %310 : vector<8x32xf32>
    %312 = math.tanh %311 : vector<8x32xf32>
    %313 = arith.mulf %308, %312 : vector<8x32xf32>
    %c6_i32 = arith.constant 6 : i32
    %314 = vector.broadcast %c6_i32 : i32 to vector<8x32xi32>
    %315 = arith.cmpi eq, %2, %314 : vector<8x32xi32>
    %316 = arith.select %315, %313, %295 : vector<8x32xi1>, vector<8x32xf32>
    %c48_91 = arith.constant 48 : index
    %c0_92 = arith.constant 0 : index
    %317 = vector.load %arg12[%c48_91, %c0_92] : memref<64x128xf32, #tpu.memory_space<vmem>>, vector<8x128xf32>
    %cst_93 = arith.constant dense<0.000000e+00> : vector<8x128xf32>
    %318 = tpu.matmul %313, %190, %cst_93 {dimension_numbers = #tpu.dot_dimension_numbers<[1], [0], [0], [1], [0, 0, 1, 1], [], []>} : vector<8x32xf32>, vector<32x128xf32>, vector<8x128xf32> -> vector<8x128xf32>
    %319 = arith.addf %317, %318 : vector<8x128xf32>
    %320 = arith.negf %319 : vector<8x128xf32>
    %321 = math.exp %320 : vector<8x128xf32>
    %cst_94 = arith.constant 1.000000e+00 : f32
    %322 = vector.broadcast %cst_94 : f32 to vector<8x128xf32>
    %323 = arith.addf %322, %321 : vector<8x128xf32>
    %324 = arith.divf %322, %323 : vector<8x128xf32>
    %325 = math.tanh %319 : vector<8x128xf32>
    %326 = vector.extract_strided_slice %324 {offsets = [0, 0], sizes = [8, 32], strides = [1, 1]} : vector<8x128xf32> to vector<8x32xf32>
    %327 = vector.extract_strided_slice %324 {offsets = [0, 32], sizes = [8, 32], strides = [1, 1]} : vector<8x128xf32> to vector<8x32xf32>
    %328 = vector.extract_strided_slice %325 {offsets = [0, 64], sizes = [8, 32], strides = [1, 1]} : vector<8x128xf32> to vector<8x32xf32>
    %329 = vector.extract_strided_slice %324 {offsets = [0, 96], sizes = [8, 32], strides = [1, 1]} : vector<8x128xf32> to vector<8x32xf32>
    %330 = arith.mulf %327, %311 : vector<8x32xf32>
    %331 = arith.mulf %326, %328 : vector<8x32xf32>
    %332 = arith.addf %330, %331 : vector<8x32xf32>
    %333 = math.tanh %332 : vector<8x32xf32>
    %334 = arith.mulf %329, %333 : vector<8x32xf32>
    %c7_i32 = arith.constant 7 : i32
    %335 = vector.broadcast %c7_i32 : i32 to vector<8x32xi32>
    %336 = arith.cmpi eq, %2, %335 : vector<8x32xi32>
    %337 = arith.select %336, %334, %316 : vector<8x32xi1>, vector<8x32xf32>
    %c56_95 = arith.constant 56 : index
    %c0_96 = arith.constant 0 : index
    %338 = vector.load %arg12[%c56_95, %c0_96] : memref<64x128xf32, #tpu.memory_space<vmem>>, vector<8x128xf32>
    %cst_97 = arith.constant dense<0.000000e+00> : vector<8x128xf32>
    %339 = tpu.matmul %334, %190, %cst_97 {dimension_numbers = #tpu.dot_dimension_numbers<[1], [0], [0], [1], [0, 0, 1, 1], [], []>} : vector<8x32xf32>, vector<32x128xf32>, vector<8x128xf32> -> vector<8x128xf32>
    %340 = arith.addf %338, %339 : vector<8x128xf32>
    %341 = arith.negf %340 : vector<8x128xf32>
    %342 = math.exp %341 : vector<8x128xf32>
    %cst_98 = arith.constant 1.000000e+00 : f32
    %343 = vector.broadcast %cst_98 : f32 to vector<8x128xf32>
    %344 = arith.addf %343, %342 : vector<8x128xf32>
    %345 = arith.divf %343, %344 : vector<8x128xf32>
    %346 = math.tanh %340 : vector<8x128xf32>
    %347 = vector.extract_strided_slice %345 {offsets = [0, 0], sizes = [8, 32], strides = [1, 1]} : vector<8x128xf32> to vector<8x32xf32>
    %348 = vector.extract_strided_slice %345 {offsets = [0, 32], sizes = [8, 32], strides = [1, 1]} : vector<8x128xf32> to vector<8x32xf32>
    %349 = vector.extract_strided_slice %346 {offsets = [0, 64], sizes = [8, 32], strides = [1, 1]} : vector<8x128xf32> to vector<8x32xf32>
    %350 = vector.extract_strided_slice %345 {offsets = [0, 96], sizes = [8, 32], strides = [1, 1]} : vector<8x128xf32> to vector<8x32xf32>
    %351 = arith.mulf %348, %332 : vector<8x32xf32>
    %352 = arith.mulf %347, %349 : vector<8x32xf32>
    %353 = arith.addf %351, %352 : vector<8x32xf32>
    %354 = math.tanh %353 : vector<8x32xf32>
    %355 = arith.mulf %350, %354 : vector<8x32xf32>
    %c8_i32 = arith.constant 8 : i32
    %356 = vector.broadcast %c8_i32 : i32 to vector<8x32xi32>
    %357 = arith.cmpi eq, %2, %356 : vector<8x32xi32>
    %358 = arith.select %357, %355, %337 : vector<8x32xi1>, vector<8x32xf32>
    %c0_99 = arith.constant 0 : index
    %c0_100 = arith.constant 0 : index
    %359 = vector.load %arg9[%c0_99, %c0_100] : memref<1x32xf32, #tpu.memory_space<vmem>>, vector<1x32xf32>
    %360 = vector.broadcast %359 : vector<1x32xf32> to vector<8x32xf32>
    %361 = arith.mulf %358, %360 : vector<8x32xf32>
    %cst_101 = arith.constant dense<0.000000e+00> : vector<8xf32>
    %362 = vector.multi_reduction <add>, %361, %cst_101 [1] : vector<8x32xf32> to vector<8xf32>
    %363 = vector.shape_cast %362 : vector<8xf32> to vector<8x1xf32>
    %c0_102 = arith.constant 0 : index
    %c0_103 = arith.constant 0 : index
    %364 = vector.load %arg10[%c0_102, %c0_103] : memref<1x1xf32, #tpu.memory_space<vmem>>, vector<1x1xf32>
    %365 = vector.broadcast %364 : vector<1x1xf32> to vector<8x1xf32>
    %366 = arith.addf %363, %365 : vector<8x1xf32>
    %367 = arith.negf %366 : vector<8x1xf32>
    %368 = math.exp %367 : vector<8x1xf32>
    %cst_104 = arith.constant 1.000000e+00 : f32
    %369 = vector.broadcast %cst_104 : f32 to vector<8x1xf32>
    %370 = arith.addf %369, %368 : vector<8x1xf32>
    %371 = arith.divf %369, %370 : vector<8x1xf32>
    %c0_105 = arith.constant 0 : index
    %c0_106 = arith.constant 0 : index
    %372 = vector.load %arg11[%c0_105, %c0_106] : memref<8x1xf32, #tpu.memory_space<vmem>>, vector<8x1xf32>
    tpu.vector_store %arg11[%c0_105, %c0_106], %371 {strides = array<i32>} : memref<8x1xf32, #tpu.memory_space<vmem>>, vector<8x1xf32>,
    return
  }
  func.func @transform_0(%arg0: i32) -> (i32, i32) {
    %c0_i32 = arith.constant 0 : i32
    %c0_i32_0 = arith.constant 0 : i32
    %c0_i32_1 = arith.constant 0 : i32
    return %c0_i32, %c0_i32_0 : i32, i32
  }
  func.func @transform_1(%arg0: i32) -> (i32, i32) {
    %c0_i32 = arith.constant 0 : i32
    %c0_i32_0 = arith.constant 0 : i32
    %c0_i32_1 = arith.constant 0 : i32
    return %c0_i32, %c0_i32_0 : i32, i32
  }
  func.func @transform_2(%arg0: i32) -> (i32, i32) {
    %c0_i32 = arith.constant 0 : i32
    %c0_i32_0 = arith.constant 0 : i32
    %c0_i32_1 = arith.constant 0 : i32
    return %c0_i32, %c0_i32_0 : i32, i32
  }
  func.func @transform_3(%arg0: i32) -> (i32, i32) {
    %c0_i32 = arith.constant 0 : i32
    %c0_i32_0 = arith.constant 0 : i32
    %c0_i32_1 = arith.constant 0 : i32
    return %c0_i32, %c0_i32_0 : i32, i32
  }
  func.func @transform_4(%arg0: i32) -> (i32, i32) {
    %c0_i32 = arith.constant 0 : i32
    %c0_i32_0 = arith.constant 0 : i32
    %c0_i32_1 = arith.constant 0 : i32
    return %c0_i32, %c0_i32_0 : i32, i32
  }
  func.func @transform_5(%arg0: i32) -> (i32, i32) {
    %c0_i32 = arith.constant 0 : i32
    %c0_i32_0 = arith.constant 0 : i32
    %c0_i32_1 = arith.constant 0 : i32
    return %c0_i32, %c0_i32_0 : i32, i32
  }
  func.func @transform_6(%arg0: i32) -> (i32, i32) {
    %c0_i32 = arith.constant 0 : i32
    %c0_i32_0 = arith.constant 0 : i32
    %c0_i32_1 = arith.constant 0 : i32
    return %c0_i32, %c0_i32_0 : i32, i32
  }
  func.func @transform_7(%arg0: i32) -> (i32, i32) {
    %c0_i32 = arith.constant 0 : i32
    %c0_i32_0 = arith.constant 0 : i32
    %c0_i32_1 = arith.constant 0 : i32
    return %c0_i32, %c0_i32_0 : i32, i32
  }
  func.func @transform_8(%arg0: i32) -> (i32, i32) {
    %c0_i32 = arith.constant 0 : i32
    %c0_i32_0 = arith.constant 0 : i32
    %c0_i32_1 = arith.constant 0 : i32
    return %c0_i32, %c0_i32_0 : i32, i32
  }
  func.func @transform_9(%arg0: i32) -> (i32, i32) {
    %c0_i32 = arith.constant 0 : i32
    %c0_i32_0 = arith.constant 0 : i32
    %c0_i32_1 = arith.constant 0 : i32
    return %c0_i32, %c0_i32_0 : i32, i32
  }
  func.func @transform_10(%arg0: i32) -> (i32, i32) {
    %c0_i32 = arith.constant 0 : i32
    %c0_i32_0 = arith.constant 0 : i32
    %c0_i32_1 = arith.constant 0 : i32
    return %c0_i32, %c0_i32_0 : i32, i32
  }
}

</mosaic_0001>

<bundles_post_ra>
// kernel: lstm_classifier_forward.1
= control target key start
LH: loop header
LB: loop body
LE: loop exit
PB: predicated region body
PF: predicated region fallthrough
CT: control target
= control target key end

     0   :  { %vm55_vm0 = vcmask 130048   ;;  %v1586_v7 = vmov 0.0   ;;  %vm139_vm5 = vcmask 261120   ;;  %s1590_s17 = smov 96   ;;  %s2031_s3 = inlined_call_operand.vmem [shape: f32[32,128], index: 3, kind: input, shape index: {}]   ;;  %s2032_s2 = inlined_call_operand.vmem [shape: f32[16,128], index: 2, kind: input, shape index: {}]   ;;  %s2033_s1 = inlined_call_operand.vmem [shape: f32[64,16], index: 1, kind: input, shape index: {}]   ;;  %s2034_s4 = inlined_call_operand.vmem [shape: f32[1,128], index: 4, kind: input, shape index: {}]   ;;  %s2035_s5 = inlined_call_operand.vmem [shape: f32[32,128], index: 5, kind: input, shape index: {}]   ;;  %s2036_s7 = inlined_call_operand.vmem [shape: f32[1,128], index: 7, kind: input, shape index: {}]   ;;  %s2037_s6 = inlined_call_operand.vmem [shape: f32[32,128], index: 6, kind: input, shape index: {}]   ;;  %s2038_s0 = inlined_call_operand.vmem [shape: s32[8,1], index: 0, kind: input, shape index: {}]   ;;  %s2039_s8 = inlined_call_operand.vmem [shape: f32[1,32], index: 8, kind: input, shape index: {}]   ;;  %s2040_s9 = inlined_call_operand.<no memory space> [shape: f32[1,1], index: 9, kind: input, shape index: {}]   ;;  %s2041_s10 = inlined_call_operand.vmem [shape: f32[8,1], index: 10, kind: output, shape index: {}]  }
   0x1   :  { %v1649_v0 = vld [vmem:[%s2031_s3 + $0x18] sm:$0xff]  ;;  %v50_v1 = vld [vmem:[%s2032_s2 + $0x8] sm:$0xff]  ;;  %v1657_v2 = vld [vmem:[%s2031_s3 + $0x10] sm:$0xff] }
   0x2   :  { %155 = vmatpush.msra.mxu1 %v1649_v0  ;;  %94 = vmatpush.msra.mxu0 %v50_v1  ;;  %v49_v3 = vld [vmem:[%s2032_s2] sm:$0xff]  ;;  %v1669_v5 = vld [vmem:[%s2031_s3 + $0x8] sm:$0xff]  ;;  %v1700_v33 = vld [vmem:[%s2035_s5 + $0x18] sm:$0xff] }
   0x3   :  { %v41_v4 = vld [vmem:[%s2033_s1] sm:$0xff]  ;;  %243 = vmatpush.msra.mxu3 %v1649_v0  ;;  %v1705_v34 = vld [vmem:[%s2035_s5 + $0x10] sm:$0xff]  ;;  %221 = vmatpush.msra.mxu2 %v1700_v33  ;;  %v1712_v35 = vld [vmem:[%s2035_s5 + $0x8] sm:$0xff] }
   0x4   :  { %156 = vmatpush.msra.mxu1 %v1657_v2  ;;  %95 = vmatpush.msra.mxu0 %v49_v3  ;;  %v1677_v6 = vld [vmem:[%s2031_s3] sm:$0xff]  ;;  %s1587_s3 = smov 64   ;;  %v42_v39 = vld [vmem:[%s2033_s1 + $0x8] sm:$0xff] }
   0x5   :  { %1396 = vmatmul.msk.f32.vlgmr.msra.gmra.mxu0 %vm55_vm0, %v41_v4  ;;  %244 = vmatpush.msra.mxu3 %v1657_v2  ;;  %v1688_v8 = vld [vmem:[%s2034_s4] ss:$0 sm:$0xff]  ;;  %s1588_s4 = smov 32  }
   0x6   :  { %157 = vmatpush.msra.mxu1 %v1669_v5  ;;  %222 = vmatpush.msra.mxu2 %v1705_v34  ;;  %v1720_v36 = vld [vmem:[%s2035_s5] sm:$0xff] }
   0x7   :  { %245 = vmatpush.msra.mxu3 %v1669_v5 }
   0x8   :  { %158 = vmatpush.msra.mxu1 %v1677_v6  ;;  %223 = vmatpush.msra.mxu2 %v1712_v35 }
   0x9   :  { %159 = vmatmul.f32.vlgmr.msra.gmra.mxu1 %v1586_v7  ;;  %246 = vmatpush.msra.mxu3 %v1677_v6 }
   0xa   :  { %306 = vmatpush.msrb.mxu1 %v1700_v33  ;;  %224 = vmatpush.msra.mxu2 %v1720_v36 }
   0xb   :  { %391 = vmatpush.msrb.mxu3 %v1700_v33 }
   0xc   :  { %307 = vmatpush.msrb.mxu1 %v1705_v34  ;;  %328 = vmatpush.msrb.mxu2 %v1649_v0 }
   0xd   :  { %392 = vmatpush.msrb.mxu3 %v1705_v34  ;;  %1397 = vmatmul.msk.f32.gmra.mxu0 %vm55_vm0, %v42_v39 }
   0xe   :  { %308 = vmatpush.msrb.mxu1 %v1712_v35  ;;  %329 = vmatpush.msrb.mxu2 %v1657_v2 }
   0xf   :  { %393 = vmatpush.msrb.mxu3 %v1712_v35 }
  0x10   :  { %309 = vmatpush.msrb.mxu1 %v1720_v36  ;;  %330 = vmatpush.msrb.mxu2 %v1669_v5 }
  0x11   :  { %394 = vmatpush.msrb.mxu3 %v1720_v36 }
  0x12   :  { %413 = vmatpush.msra.mxu1 %v1649_v0  ;;  %331 = vmatpush.msrb.mxu2 %v1677_v6 }
  0x14   :  { %414 = vmatpush.msra.mxu1 %v1657_v2 }
  0x16   :  { %415 = vmatpush.msra.mxu1 %v1669_v5 }
  0x18   :  { %416 = vmatpush.msra.mxu1 %v1677_v6 }
  0x82   :  { %v97_v9 = vpop.f32.mrf.mxu0 }
  0x83   :  { %v98_v10 = vadd.f32 %v1688_v8, %v97_v9  ;;  %v43_v9 = vld [vmem:[%s2033_s1 + $0x10] sm:$0xff] }
  0x84   :  { %1398 = vmatmul.msk.f32.gmra.mxu0 %vm55_vm0, %v43_v9 }
  0x86   :  { %v160_v11 = vpop.f32.mrf.mxu1 }
  0x87   :  { %v163_v12 = vadd.f32 %v160_v11, %v98_v10 }
  0x89   :  { %1454 = vtanh.f32 %v163_v12  ;;  %v1404_v14 = vmul.f32 -1.442695, %v163_v12 }
  0x8a   :  { %v100_v41 = vpop.f32.mrf.mxu0 }
  0x8b   :  { %1456 = vpow2.f32 %v1404_v14  ;;  %v101_v42 = vadd.f32 %v1688_v8, %v100_v41 }
  0x8f   :  { %v1455_v13 = vpop.eup %1454 }
  0x90   :  { %186 = vrot.lane.b32.xlu0 %v1455_v13, %s1587_s3 }
  0x91   :  { %v1457_v15 = vpop.eup %1456 }
  0x92   :  { %v167_v16 = vadd.f32 1.0, %v1457_v15 }
  0x94   :  { %1458 = vrcp.f32 %v167_v16  ;;  %v179_v22 = vand.u32 2147483648, %v167_v16  ;;  %vm173_vm2 = vweird.f32 %v167_v16  ;;  %v177_v23 = vand.u32 2147483647, %v167_v16 }
  0x96   :  { %v180_v25 = vor.u32 1.1754944e-38, %v179_v22  ;;  %vm178_vm4 = vcmp.eq.f32.partialorder %v177_v23, 8.507059e+37 }
  0x9a   :  { %v1459_v17 = vpop.eup %1458 }
  0x9b   :  { %v169_v18 = vmul.f32 %v1459_v17, %v167_v16  ;;  %vm174_vm1 = vweird.f32 %v1459_v17 }
  0x9c   :  { %vm175_vm3 = vmor %vm173_vm2, %vm174_vm1 }
  0x9d   :  { %v170_v19 = vsub.f32 1.0, %v169_v18 }
  0x9f   :  { %v171_v20 = vmul.f32 %v1459_v17, %v170_v19 }
  0xa1   :  { %v172_v21 = vadd.f32 %v1459_v17, %v171_v20 }
  0xa3   :  { %v176_v24 = vsel %vm175_vm3, %v1459_v17, %v172_v21 }
  0xa4   :  { %v181_v27 = vsel %vm178_vm4, %v180_v25, %v176_v24 }
  0xa5   :  { %v184_v29 = vmul.f32 0.0, %v181_v27 }
 0x101   :  { %v103_v12 = vpop.f32.mrf.mxu0 }
 0x102   :  { %v187_v26 = vpop.permute.xlu0 %186  ;;  %v104_v13 = vadd.f32 %v1688_v8, %v103_v12 }
 0x103   :  { %v189_v28 = vmul.f32 %v187_v26, %v181_v27 }
 0x105   :  { %191 = vrot.lane.b32.xlu0 %v189_v28, %s1588_s4 }
 0x177   :  { %v192_v30 = vpop.permute.xlu0 %191 }
 0x178   :  { %v1693_v31 = vadd.f32 %v192_v30, %v184_v29 }
 0x17a   :  { %1460 = vtanh.f32 %v1693_v31 }
 0x180   :  { %v1461_v32 = vpop.eup %1460 }
 0x181   :  { %197 = vrot.lane.b32.xlu1 %v1461_v32, %s1587_s3 }
 0x1f3   :  { %v198_v37 = vpop.permute.xlu1 %197 }
 0x1f4   :  { %v200_v38 = vmul.f32 %v198_v37, %v181_v27 }
 0x1f6   :  { %205 = vrot.lane.b32.xlu1 %v200_v38, %s1588_s4 }
 0x268   :  { %v206_v40 = vpop.permute.xlu1 %205 }
 0x269   :  { %1405 = vmatmul.msk.f32.vlgmr.msra.gmra.mxu2 %vm139_vm5, %v206_v40  ;;  %1406 = vmatmul.msk.f32.vlgmr.msra.gmra.mxu3 %vm139_vm5, %v206_v40  ;;  %v44_v40 = vld [vmem:[%s2033_s1 + $0x18] sm:$0xff] }
 0x26a   :  { %498 = vmatpush.msra.mxu3 %v1649_v0  ;;  %476 = vmatpush.msra.mxu2 %v1700_v33 }
 0x26b   :  { %1399 = vmatmul.msk.f32.gmra.mxu0 %vm55_vm0, %v44_v40 }
 0x26c   :  { %499 = vmatpush.msra.mxu3 %v1657_v2  ;;  %477 = vmatpush.msra.mxu2 %v1705_v34 }
 0x26e   :  { %500 = vmatpush.msra.mxu3 %v1669_v5  ;;  %478 = vmatpush.msra.mxu2 %v1712_v35 }
 0x270   :  { %501 = vmatpush.msra.mxu3 %v1677_v6  ;;  %479 = vmatpush.msra.mxu2 %v1720_v36 }
 0x2ec   :  { %v248_v43 = vpop.f32.mrf.mxu3  ;;  %v1772_v11 = vpop.f32.mrf.mxu2 }
 0x2ed   :  { %v251_v44 = vadd.f32 %v248_v43, %v101_v42 }
 0x2ef   :  { %1462 = vtanh.f32 %v251_v44  ;;  %v1407_v46 = vmul.f32 -1.442695, %v251_v44 }
 0x2f1   :  { %1464 = vpow2.f32 %v1407_v46 }
 0x2f5   :  { %v1463_v45 = vpop.eup %1462 }
 0x2f6   :  { %274 = vrot.lane.b32.xlu2 %v1463_v45, %s1587_s3  ;;  %v106_v45 = vpop.f32.mrf.mxu0 }
 0x2f7   :  { %v1465_v47 = vpop.eup %1464  ;;  %v107_v46 = vadd.f32 %v1688_v8, %v106_v45 }
 0x2f8   :  { %v255_v48 = vadd.f32 1.0, %v1465_v47 }
 0x2fa   :  { %1466 = vrcp.f32 %v255_v48  ;;  %v267_v54 = vand.u32 2147483648, %v255_v48  ;;  %vm261_vm7 = vweird.f32 %v255_v48  ;;  %v265_v55 = vand.u32 2147483647, %v255_v48 }
 0x2fc   :  { %v268_v57 = vor.u32 1.1754944e-38, %v267_v54  ;;  %vm266_vm9 = vcmp.eq.f32.partialorder %v265_v55, 8.507059e+37 }
 0x300   :  { %v1467_v49 = vpop.eup %1466 }
 0x301   :  { %v257_v50 = vmul.f32 %v1467_v49, %v255_v48  ;;  %vm262_vm6 = vweird.f32 %v1467_v49 }
 0x302   :  { %vm263_vm8 = vmor %vm261_vm7, %vm262_vm6 }
 0x303   :  { %v258_v51 = vsub.f32 1.0, %v257_v50 }
 0x305   :  { %v259_v52 = vmul.f32 %v1467_v49, %v258_v51 }
 0x307   :  { %v260_v53 = vadd.f32 %v1467_v49, %v259_v52 }
 0x309   :  { %v264_v56 = vsel %vm263_vm8, %v1467_v49, %v260_v53 }
 0x30a   :  { %v269_v59 = vsel %vm266_vm9, %v268_v57, %v264_v56 }
 0x30b   :  { %v272_v61 = vmul.f32 %v269_v59, %v1693_v31 }
 0x350   :  { %v275_v58 = vpop.permute.xlu2 %274 }
 0x351   :  { %v277_v60 = vmul.f32 %v275_v58, %v269_v59 }
 0x353   :  { %279 = vrot.lane.b32.xlu2 %v277_v60, %s1588_s4 }
 0x3ad   :  { %v280_v62 = vpop.permute.xlu2 %279 }
 0x3ae   :  { %v282_v63 = vadd.f32 %v280_v62, %v272_v61 }
 0x3b0   :  { %1468 = vtanh.f32 %v282_v63 }
 0x3b6   :  { %v1469_v1 = vpop.eup %1468 }
 0x3b7   :  { %285 = vrot.lane.b32.xlu0 %v1469_v1, %s1587_s3 }
 0x429   :  { %v286_v3 = vpop.permute.xlu0 %285 }
 0x42a   :  { %v288_v4 = vmul.f32 %v286_v3, %v269_v59 }
 0x42c   :  { %290 = vrot.lane.b32.xlu1 %v288_v4, %s1588_s4 }
 0x49e   :  { %v291_v10 = vpop.permute.xlu1 %290 }
 0x49f   :  { %1408 = vmatmul.msk.f32.vlgmr.msrb.gmra.mxu1 %vm139_vm5, %v291_v10  ;;  %1409 = vmatmul.msk.f32.vlgmr.msrb.gmra.mxu2 %vm139_vm5, %v291_v10 }
 0x4a0   :  { %583 = vmatpush.msrb.mxu2 %v1649_v0  ;;  %561 = vmatpush.msrb.mxu1 %v1700_v33 }
 0x4a2   :  { %584 = vmatpush.msrb.mxu2 %v1657_v2  ;;  %562 = vmatpush.msrb.mxu1 %v1705_v34 }
 0x4a4   :  { %585 = vmatpush.msrb.mxu2 %v1669_v5  ;;  %563 = vmatpush.msrb.mxu1 %v1712_v35 }
 0x4a6   :  { %586 = vmatpush.msrb.mxu2 %v1677_v6  ;;  %564 = vmatpush.msrb.mxu1 %v1720_v36 }
 0x51c   :  { %v1793_v44 = vpop.f32.mrf.mxu1 }
 0x522   :  { %v333_v14 = vpop.f32.mrf.mxu2 }
 0x523   :  { %v336_v15 = vadd.f32 %v333_v14, %v104_v13  ;;  %v45_v14 = vld [vmem:[%s2033_s1 + $0x20] sm:$0xff] }
 0x524   :  { %1400 = vmatmul.msk.f32.gmra.mxu0 %vm55_vm0, %v45_v14 }
 0x525   :  { %1470 = vtanh.f32 %v336_v15  ;;  %v1410_v17 = vmul.f32 -1.442695, %v336_v15 }
 0x527   :  { %1472 = vpow2.f32 %v1410_v17 }
 0x52b   :  { %v1471_v16 = vpop.eup %1470 }
 0x52c   :  { %359 = vrot.lane.b32.xlu2 %v1471_v16, %s1587_s3 }
 0x52d   :  { %v1473_v18 = vpop.eup %1472 }
 0x52e   :  { %v340_v19 = vadd.f32 1.0, %v1473_v18 }
 0x530   :  { %1474 = vrcp.f32 %v340_v19  ;;  %v352_v25 = vand.u32 2147483648, %v340_v19  ;;  %vm346_vm11 = vweird.f32 %v340_v19  ;;  %v350_v26 = vand.u32 2147483647, %v340_v19 }
 0x532   :  { %v353_v28 = vor.u32 1.1754944e-38, %v352_v25  ;;  %vm351_vm13 = vcmp.eq.f32.partialorder %v350_v26, 8.507059e+37 }
 0x536   :  { %v1475_v20 = vpop.eup %1474 }
 0x537   :  { %v342_v21 = vmul.f32 %v1475_v20, %v340_v19  ;;  %vm347_vm10 = vweird.f32 %v1475_v20 }
 0x538   :  { %vm348_vm12 = vmor %vm346_vm11, %vm347_vm10 }
 0x539   :  { %v343_v22 = vsub.f32 1.0, %v342_v21 }
 0x53b   :  { %v344_v23 = vmul.f32 %v1475_v20, %v343_v22 }
 0x53d   :  { %v345_v24 = vadd.f32 %v1475_v20, %v344_v23 }
 0x53f   :  { %v349_v27 = vsel %vm348_vm12, %v1475_v20, %v345_v24 }
 0x540   :  { %v354_v30 = vsel %vm351_vm13, %v353_v28, %v349_v27 }
 0x541   :  { %v357_v32 = vmul.f32 %v354_v30, %v282_v63 }
 0x586   :  { %v360_v29 = vpop.permute.xlu2 %359 }
 0x587   :  { %v362_v31 = vmul.f32 %v360_v29, %v354_v30 }
 0x589   :  { %364 = vrot.lane.b32.xlu0 %v362_v31, %s1588_s4 }
 0x5a1   :  { %v109_v17 = vpop.f32.mrf.mxu0 }
 0x5a2   :  { %v110_v18 = vadd.f32 %v1688_v8, %v109_v17 }
 0x5fb   :  { %v365_v37 = vpop.permute.xlu0 %364 }
 0x5fc   :  { %v367_v38 = vadd.f32 %v365_v37, %v357_v32 }
 0x5fe   :  { %1476 = vtanh.f32 %v367_v38 }
 0x604   :  { %v1477_v39 = vpop.eup %1476 }
 0x605   :  { %370 = vrot.lane.b32.xlu1 %v1477_v39, %s1587_s3 }
 0x677   :  { %v371_v41 = vpop.permute.xlu1 %370 }
 0x678   :  { %v373_v42 = vmul.f32 %v371_v41, %v354_v30 }
 0x67a   :  { %375 = vrot.lane.b32.xlu2 %v373_v42, %s1588_s4 }
 0x6d4   :  { %v376_v43 = vpop.permute.xlu2 %375 }
 0x6d5   :  { %1411 = vmatmul.msk.f32.vlgmr.msrb.gmra.mxu3 %vm139_vm5, %v376_v43  ;;  %1412 = vmatmul.msk.f32.vlgmr.msra.gmra.mxu1 %vm139_vm5, %v376_v43  ;;  %v46_v43 = vld [vmem:[%s2033_s1 + $0x28] sm:$0xff] }
 0x6d6   :  { %668 = vmatpush.msra.mxu1 %v1649_v0  ;;  %646 = vmatpush.msrb.mxu3 %v1700_v33 }
 0x6d7   :  { %1401 = vmatmul.msk.f32.gmra.mxu0 %vm55_vm0, %v46_v43  ;;  %v1862_v43 = vld [vmem:[%s2037_s6 + $0x10] sm:$0xff] }
 0x6d8   :  { %669 = vmatpush.msra.mxu1 %v1657_v2  ;;  %647 = vmatpush.msrb.mxu3 %v1705_v34 }
 0x6da   :  { %670 = vmatpush.msra.mxu1 %v1669_v5  ;;  %648 = vmatpush.msrb.mxu3 %v1712_v35 }
 0x6dc   :  { %671 = vmatpush.msra.mxu1 %v1677_v6  ;;  %649 = vmatpush.msrb.mxu3 %v1720_v36 }
 0x752   :  { %v418_v47 = vpop.f32.mrf.mxu1 }
 0x753   :  { %v421_v48 = vadd.f32 %v418_v47, %v107_v46 }
 0x754   :  { %v112_v47 = vpop.f32.mrf.mxu0 }
 0x755   :  { %1478 = vtanh.f32 %v421_v48  ;;  %v1413_v50 = vmul.f32 -1.442695, %v421_v48  ;;  %v113_v48 = vadd.f32 %v1688_v8, %v112_v47  ;;  %v1872_v47 = vld [vmem:[%s2037_s6 + $0x8] sm:$0xff] }
 0x757   :  { %1480 = vpow2.f32 %v1413_v50 }
 0x758   :  { %v1814_v16 = vpop.f32.mrf.mxu3 }
 0x75b   :  { %v1479_v49 = vpop.eup %1478 }
 0x75c   :  { %444 = vrot.lane.b32.xlu0 %v1479_v49, %s1587_s3 }
 0x75d   :  { %v1481_v51 = vpop.eup %1480 }
 0x75e   :  { %v425_v52 = vadd.f32 1.0, %v1481_v51 }
 0x760   :  { %1482 = vrcp.f32 %v425_v52  ;;  %v437_v58 = vand.u32 2147483648, %v425_v52  ;;  %vm431_vm15 = vweird.f32 %v425_v52  ;;  %v435_v59 = vand.u32 2147483647, %v425_v52 }
 0x762   :  { %v438_v61 = vor.u32 1.1754944e-38, %v437_v58  ;;  %vm436_vm2 = vcmp.eq.f32.partialorder %v435_v59, 8.507059e+37 }
 0x766   :  { %v1483_v53 = vpop.eup %1482 }
 0x767   :  { %v427_v54 = vmul.f32 %v1483_v53, %v425_v52  ;;  %vm432_vm14 = vweird.f32 %v1483_v53 }
 0x768   :  { %vm433_vm1 = vmor %vm431_vm15, %vm432_vm14 }
 0x769   :  { %v428_v55 = vsub.f32 1.0, %v427_v54 }
 0x76b   :  { %v429_v56 = vmul.f32 %v1483_v53, %v428_v55 }
 0x76d   :  { %v430_v57 = vadd.f32 %v1483_v53, %v429_v56 }
 0x76f   :  { %v434_v60 = vsel %vm433_vm1, %v1483_v53, %v430_v57 }
 0x770   :  { %v439_v63 = vsel %vm436_vm2, %v438_v61, %v434_v60 }
 0x771   :  { %v442_v3 = vmul.f32 %v439_v63, %v367_v38 }
 0x7ce   :  { %v445_v62 = vpop.permute.xlu0 %444 }
 0x7cf   :  { %v447_v1 = vmul.f32 %v445_v62, %v439_v63 }
 0x7d1   :  { %449 = vrot.lane.b32.xlu1 %v447_v1, %s1588_s4 }
 0x843   :  { %v450_v4 = vpop.permute.xlu1 %449 }
 0x844   :  { %v452_v9 = vadd.f32 %v450_v4, %v442_v3 }
 0x846   :  { %1484 = vtanh.f32 %v452_v9 }
 0x84c   :  { %v1485_v10 = vpop.eup %1484 }
 0x84d   :  { %455 = vrot.lane.b32.xlu2 %v1485_v10, %s1587_s3 }
 0x8a7   :  { %v456_v12 = vpop.permute.xlu2 %455 }
 0x8a8   :  { %v458_v13 = vmul.f32 %v456_v12, %v439_v63 }
 0x8aa   :  { %460 = vrot.lane.b32.xlu0 %v458_v13, %s1588_s4 }
 0x91c   :  { %v461_v15 = vpop.permute.xlu0 %460 }
 0x91d   :  { %1414 = vmatmul.msk.f32.vlgmr.msra.gmra.mxu2 %vm139_vm5, %v461_v15  ;;  %1415 = vmatmul.msk.f32.vlgmr.msra.gmra.mxu3 %vm139_vm5, %v461_v15 }
 0x91e   :  { %731 = vmatpush.msra.mxu2 %v1700_v33  ;;  %753 = vmatpush.msra.mxu3 %v1649_v0 }
 0x920   :  { %732 = vmatpush.msra.mxu2 %v1705_v34  ;;  %754 = vmatpush.msra.mxu3 %v1657_v2 }
 0x922   :  { %733 = vmatpush.msra.mxu2 %v1712_v35  ;;  %755 = vmatpush.msra.mxu3 %v1669_v5 }
 0x924   :  { %734 = vmatpush.msra.mxu2 %v1720_v36  ;;  %756 = vmatpush.msra.mxu3 %v1677_v6 }
 0x9a0   :  { %v503_v19 = vpop.f32.mrf.mxu3  ;;  %v1831_v46 = vpop.f32.mrf.mxu2 }
 0x9a1   :  { %v506_v20 = vadd.f32 %v503_v19, %v110_v18 }
 0x9a3   :  { %1486 = vtanh.f32 %v506_v20  ;;  %v1416_v2 = vmul.f32 -1.442695, %v506_v20 }
 0x9a5   :  { %1488 = vpow2.f32 %v1416_v2 }
 0x9a9   :  { %v1487_v0 = vpop.eup %1486 }
 0x9aa   :  { %529 = vrot.lane.b32.xlu1 %v1487_v0, %s1587_s3 }
 0x9ab   :  { %v1489_v21 = vpop.eup %1488 }
 0x9ac   :  { %v510_v22 = vadd.f32 1.0, %v1489_v21 }
 0x9ae   :  { %1490 = vrcp.f32 %v510_v22  ;;  %v522_v26 = vand.u32 2147483648, %v510_v22  ;;  %vm516_vm4 = vweird.f32 %v510_v22  ;;  %v520_v27 = vand.u32 2147483647, %v510_v22 }
 0x9b0   :  { %v523_v29 = vor.u32 1.1754944e-38, %v522_v26  ;;  %vm521_vm7 = vcmp.eq.f32.partialorder %v520_v27, 8.507059e+37 }
 0x9b4   :  { %v1491_v5 = vpop.eup %1490 }
 0x9b5   :  { %v512_v23 = vmul.f32 %v1491_v5, %v510_v22  ;;  %vm517_vm3 = vweird.f32 %v1491_v5 }
 0x9b6   :  { %vm518_vm6 = vmor %vm516_vm4, %vm517_vm3 }
 0x9b7   :  { %v513_v24 = vsub.f32 1.0, %v512_v23 }
 0x9b9   :  { %v514_v6 = vmul.f32 %v1491_v5, %v513_v24 }
 0x9bb   :  { %v515_v25 = vadd.f32 %v1491_v5, %v514_v6 }
 0x9bd   :  { %v519_v28 = vsel %vm518_vm6, %v1491_v5, %v515_v25 }
 0x9be   :  { %v524_v31 = vsel %vm521_vm7, %v523_v29, %v519_v28 }
 0x9bf   :  { %v527_v37 = vmul.f32 %v524_v31, %v452_v9  ;;  %v47_v9 = vld [vmem:[%s2033_s1 + $0x30] sm:$0xff] }
 0x9c0   :  { %1402 = vmatmul.msk.f32.gmra.mxu0 %vm55_vm0, %v47_v9 }
 0xa1c   :  { %v530_v30 = vpop.permute.xlu1 %529 }
 0xa1d   :  { %v532_v32 = vmul.f32 %v530_v30, %v524_v31 }
 0xa1f   :  { %534 = vrot.lane.b32.xlu2 %v532_v32, %s1588_s4 }
 0xa3d   :  { %v115_v15 = vpop.f32.mrf.mxu0 }
 0xa3e   :  { %v116_v17 = vadd.f32 %v1688_v8, %v115_v15 }
 0xa79   :  { %v535_v38 = vpop.permute.xlu2 %534 }
 0xa7a   :  { %v537_v39 = vadd.f32 %v535_v38, %v527_v37 }
 0xa7c   :  { %1492 = vtanh.f32 %v537_v39 }
 0xa82   :  { %v1493_v40 = vpop.eup %1492 }
 0xa83   :  { %540 = vrot.lane.b32.xlu0 %v1493_v40, %s1587_s3 }
 0xaf5   :  { %v541_v41 = vpop.permute.xlu0 %540 }
 0xaf6   :  { %v543_v42 = vmul.f32 %v541_v41, %v524_v31 }
 0xaf8   :  { %545 = vrot.lane.b32.xlu1 %v543_v42, %s1588_s4  ;;  %v1857_v42 = vld [vmem:[%s2037_s6 + $0x18] sm:$0xff] }
 0xb6a   :  { %v546_v45 = vpop.permute.xlu1 %545 }
 0xb6b   :  { %1417 = vmatmul.msk.f32.vlgmr.msrb.gmra.mxu1 %vm139_vm5, %v546_v45  ;;  %1418 = vmatmul.msk.f32.vlgmr.msrb.gmra.mxu2 %vm139_vm5, %v546_v45  ;;  %v48_v45 = vld [vmem:[%s2033_s1 + $0x38] sm:$0xff] }
 0xb6c   :  { %816 = vmatpush.msrb.mxu1 %v1700_v33  ;;  %842 = vmatpush.msrb.mxu2 %v1857_v42 }
 0xb6d   :  { %1403 = vmatmul.msk.f32.gmra.mxu0 %vm55_vm0, %v48_v45 }
 0xb6e   :  { %817 = vmatpush.msrb.mxu1 %v1705_v34  ;;  %843 = vmatpush.msrb.mxu2 %v1862_v43 }
 0xb70   :  { %818 = vmatpush.msrb.mxu1 %v1712_v35  ;;  %844 = vmatpush.msrb.mxu2 %v1872_v47 }
 0xb72   :  { %819 = vmatpush.msrb.mxu1 %v1720_v36 }
 0xbe8   :  { %v1844_v14 = vpop.f32.mrf.mxu1 }
 0xbee   :  { %v588_v49 = vpop.f32.mrf.mxu2 }
 0xbef   :  { %v591_v50 = vadd.f32 %v588_v49, %v113_v48  ;;  %v1880_v48 = vld [vmem:[%s2037_s6] sm:$0xff] }
 0xbf0   :  { %845 = vmatpush.msrb.mxu2 %v1880_v48 }
 0xbf1   :  { %1494 = vtanh.f32 %v591_v50  ;;  %v1419_v52 = vmul.f32 -1.442695, %v591_v50 }
 0xbf3   :  { %1496 = vpow2.f32 %v1419_v52 }
 0xbf7   :  { %v1495_v51 = vpop.eup %1494 }
 0xbf8   :  { %614 = vrot.lane.b32.xlu2 %v1495_v51, %s1587_s3  ;;  %v1910_v51 = vld [vmem:[%s2036_s7] ss:$0 sm:$0xff] }
 0xbf9   :  { %v1497_v33 = vpop.eup %1496  ;;  %v227_v52 = vadd.f32 %v1910_v51, %v1772_v11 }
 0xbfa   :  { %v595_v53 = vadd.f32 1.0, %v1497_v33 }
 0xbfc   :  { %1498 = vrcp.f32 %v595_v53  ;;  %v607_v56 = vand.u32 2147483648, %v595_v53  ;;  %vm601_vm9 = vweird.f32 %v595_v53  ;;  %v605_v57 = vand.u32 2147483647, %v595_v53 }
 0xbfe   :  { %v608_v59 = vor.u32 1.1754944e-38, %v607_v56  ;;  %vm606_vm11 = vcmp.eq.f32.partialorder %v605_v57, 8.507059e+37 }
 0xc02   :  { %v1499_v34 = vpop.eup %1498 }
 0xc03   :  { %v597_v35 = vmul.f32 %v1499_v34, %v595_v53  ;;  %vm602_vm8 = vweird.f32 %v1499_v34 }
 0xc04   :  { %vm603_vm10 = vmor %vm601_vm9, %vm602_vm8 }
 0xc05   :  { %v598_v54 = vsub.f32 1.0, %v597_v35 }
 0xc07   :  { %v599_v36 = vmul.f32 %v1499_v34, %v598_v54 }
 0xc09   :  { %v600_v55 = vadd.f32 %v1499_v34, %v599_v36 }
 0xc0b   :  { %v604_v58 = vsel %vm603_vm10, %v1499_v34, %v600_v55 }
 0xc0c   :  { %v609_v61 = vsel %vm606_vm11, %v608_v59, %v604_v58  ;;  %v118_v59 = vpop.f32.mrf.mxu0 }
 0xc0d   :  { %v612_v63 = vmul.f32 %v609_v61, %v537_v39 }
 0xc52   :  { %v615_v60 = vpop.permute.xlu2 %614 }
 0xc53   :  { %v617_v62 = vmul.f32 %v615_v60, %v609_v61 }
 0xc55   :  { %619 = vrot.lane.b32.xlu0 %v617_v62, %s1588_s4  ;;  %v119_v62 = vadd.f32 %v1688_v8, %v118_v59 }
 0xcc7   :  { %v620_v1 = vpop.permute.xlu0 %619 }
 0xcc8   :  { %v622_v3 = vadd.f32 %v620_v1, %v612_v63 }
 0xcca   :  { %1500 = vtanh.f32 %v622_v3 }
 0xcd0   :  { %v1501_v4 = vpop.eup %1500 }
 0xcd1   :  { %625 = vrot.lane.b32.xlu1 %v1501_v4, %s1587_s3 }
 0xd43   :  { %v626_v10 = vpop.permute.xlu1 %625 }
 0xd44   :  { %v628_v12 = vmul.f32 %v626_v10, %v609_v61 }
 0xd46   :  { %630 = vrot.lane.b32.xlu2 %v628_v12, %s1588_s4 }
 0xda0   :  { %v631_v13 = vpop.permute.xlu2 %630 }
 0xda1   :  { %1420 = vmatmul.msk.f32.vlgmr.msrb.gmra.mxu3 %vm139_vm5, %v631_v13  ;;  %1421 = vmatmul.msk.f32.vlgmr.msra.gmra.mxu1 %vm139_vm5, %v631_v13 }
 0xda2   :  { %908 = vmatpush.msrb.mxu3 %v1857_v42  ;;  %974 = vmatpush.msra.mxu1 %v1857_v42 }
 0xda4   :  { %909 = vmatpush.msrb.mxu3 %v1862_v43  ;;  %975 = vmatpush.msra.mxu1 %v1862_v43 }
 0xda6   :  { %910 = vmatpush.msrb.mxu3 %v1872_v47  ;;  %976 = vmatpush.msra.mxu1 %v1872_v47 }
 0xda8   :  { %911 = vmatpush.msrb.mxu3 %v1880_v48  ;;  %977 = vmatpush.msra.mxu1 %v1880_v48 }
 0xe1e   :  { %v673_v18 = vpop.f32.mrf.mxu1 }
 0xe1f   :  { %v676_v19 = vadd.f32 %v673_v18, %v116_v17 }
 0xe21   :  { %1502 = vtanh.f32 %v676_v19  ;;  %v1422_v0 = vmul.f32 -1.442695, %v676_v19 }
 0xe23   :  { %1504 = vpow2.f32 %v1422_v0 }
 0xe24   :  { %v1915_v57 = vpop.f32.mrf.mxu3 }
 0xe27   :  { %v1503_v20 = vpop.eup %1502 }
 0xe28   :  { %699 = vrot.lane.b32.xlu0 %v1503_v20, %s1587_s3 }
 0xe29   :  { %v1505_v2 = vpop.eup %1504 }
 0xe2a   :  { %v680_v21 = vadd.f32 1.0, %v1505_v2 }
 0xe2c   :  { %1506 = vrcp.f32 %v680_v21  ;;  %v692_v25 = vand.u32 2147483648, %v680_v21  ;;  %vm686_vm13 = vweird.f32 %v680_v21  ;;  %v690_v26 = vand.u32 2147483647, %v680_v21 }
 0xe2e   :  { %v693_v28 = vor.u32 1.1754944e-38, %v692_v25  ;;  %vm691_vm15 = vcmp.eq.f32.partialorder %v690_v26, 8.507059e+37 }
 0xe32   :  { %v1507_v22 = vpop.eup %1506 }
 0xe33   :  { %v682_v5 = vmul.f32 %v1507_v22, %v680_v21  ;;  %vm687_vm12 = vweird.f32 %v1507_v22 }
 0xe34   :  { %vm688_vm14 = vmor %vm686_vm13, %vm687_vm12 }
 0xe35   :  { %v683_v23 = vsub.f32 1.0, %v682_v5 }
 0xe37   :  { %v684_v24 = vmul.f32 %v1507_v22, %v683_v23 }
 0xe39   :  { %v685_v6 = vadd.f32 %v1507_v22, %v684_v24 }
 0xe3b   :  { %v689_v27 = vsel %vm688_vm14, %v1507_v22, %v685_v6 }
 0xe3c   :  { %v694_v30 = vsel %vm691_vm15, %v693_v28, %v689_v27 }
 0xe3d   :  { %v697_v32 = vmul.f32 %v694_v30, %v622_v3 }
 0xe9a   :  { %v700_v29 = vpop.permute.xlu0 %699 }
 0xe9b   :  { %v702_v31 = vmul.f32 %v700_v29, %v694_v30 }
 0xe9d   :  { %704 = vrot.lane.b32.xlu1 %v702_v31, %s1588_s4 }
 0xf0f   :  { %v705_v37 = vpop.permute.xlu1 %704 }
 0xf10   :  { %v1849_v38 = vadd.f32 %v705_v37, %v697_v32  ;;  %v312_v37 = vadd.f32 %v1910_v51, %v1793_v44 }
 0xf12   :  { %1508 = vtanh.f32 %v1849_v38 }
 0xf18   :  { %v1509_v39 = vpop.eup %1508 }
 0xf19   :  { %710 = vrot.lane.b32.xlu2 %v1509_v39, %s1587_s3 }
 0xf73   :  { %v711_v40 = vpop.permute.xlu2 %710 }
 0xf74   :  { %v713_v41 = vmul.f32 %v711_v40, %v694_v30 }
 0xf76   :  { %715 = vrot.lane.b32.xlu0 %v713_v41, %s1588_s4 }
 0xfe8   :  { %v716_v49 = vpop.permute.xlu0 %715 }
 0xfe9   :  { %1423 = vmatmul.msk.f32.vlgmr.msra.gmra.mxu2 %vm139_vm5, %v716_v49  ;;  %1424 = vmatmul.msk.f32.vlgmr.msra.gmra.mxu3 %vm139_vm5, %v716_v49 }
 0xfea   :  { %1040 = vmatpush.msra.mxu2 %v1857_v42  ;;  %1106 = vmatpush.msra.mxu3 %v1857_v42 }
 0xfec   :  { %1041 = vmatpush.msra.mxu2 %v1862_v43  ;;  %1107 = vmatpush.msra.mxu3 %v1862_v43 }
 0xfee   :  { %1042 = vmatpush.msra.mxu2 %v1872_v47  ;;  %1108 = vmatpush.msra.mxu3 %v1872_v47 }
 0xff0   :  { %1043 = vmatpush.msra.mxu2 %v1880_v48  ;;  %1109 = vmatpush.msra.mxu3 %v1880_v48 }
 0xff1   :  { %846 = vmatmul.f32.vlgmr.msrb.gmra.mxu2 %v1586_v7 }
 0xff2   :  { %1238 = vmatpush.msrb.mxu2 %v1857_v42 }
 0xff4   :  { %1239 = vmatpush.msrb.mxu2 %v1862_v43 }
 0xff6   :  { %1240 = vmatpush.msrb.mxu2 %v1872_v47 }
 0xff8   :  { %1241 = vmatpush.msrb.mxu2 %v1880_v48 }
0x106c   :  { %v1905_v50 = vpop.f32.mrf.mxu2  ;;  %v758_v63 = vpop.f32.mrf.mxu3 }
0x106d   :  { %v761_v4 = vadd.f32 %v758_v63, %v119_v62 }
0x106f   :  { %v1425_v19 = vmul.f32 -1.442695, %v761_v4 }
0x1074   :  { %v847_v33 = vpop.f32.mrf.mxu2 }
0x1075   :  { %v850_v7 = vadd.f32 %v847_v33, %v227_v52 }
0x1077   :  { %1510 = vtanh.f32 %v850_v7  ;;  %v1427_v34 = vmul.f32 -1.442695, %v850_v7 }
0x1079   :  { %1512 = vpow2.f32 %v1427_v34 }
0x107d   :  { %v1511_v53 = vpop.eup %1510 }
0x107e   :  { %873 = vrot.lane.b32.xlu1 %v1511_v53, %s1587_s3 }
0x107f   :  { %v1513_v35 = vpop.eup %1512 }
0x1080   :  { %v854_v54 = vadd.f32 1.0, %v1513_v35 }
0x1082   :  { %1514 = vrcp.f32 %v854_v54  ;;  %v866_v11 = vand.u32 2147483648, %v854_v54  ;;  %vm860_vm1 = vweird.f32 %v854_v54  ;;  %v864_v61 = vand.u32 2147483647, %v854_v54 }
0x1083   :  { %1516 = vtanh.f32 %v761_v4 }
0x1084   :  { %v867_v3 = vor.u32 1.1754944e-38, %v866_v11  ;;  %vm865_vm3 = vcmp.eq.f32.partialorder %v864_v61, 8.507059e+37 }
0x1088   :  { %v1515_v36 = vpop.eup %1514 }
0x1089   :  { %v856_v55 = vmul.f32 %v1515_v36, %v854_v54  ;;  %vm861_vm0 = vweird.f32 %v1515_v36  ;;  %v1517_v13 = vpop.eup %1516 }
0x108a   :  { %vm862_vm2 = vmor %vm860_vm1, %vm861_vm0 }
0x108b   :  { %v857_v56 = vsub.f32 1.0, %v856_v55 }
0x108d   :  { %v858_v58 = vmul.f32 %v1515_v36, %v857_v56 }
0x108f   :  { %v859_v60 = vadd.f32 %v1515_v36, %v858_v58 }
0x1091   :  { %v863_v1 = vsel %vm862_vm2, %v1515_v36, %v859_v60 }
0x1092   :  { %v868_v10 = vsel %vm865_vm3, %v867_v3, %v863_v1 }
0x1093   :  { %v871_v15 = vmul.f32 0.0, %v868_v10 }
0x10f0   :  { %v874_v9 = vpop.permute.xlu1 %873 }
0x10f1   :  { %v876_v12 = vmul.f32 %v874_v9, %v868_v10 }
0x10f3   :  { %878 = vrot.lane.b32.xlu2 %v876_v12, %s1588_s4 }
0x10fb   :  { %784 = vrot.lane.b32.xlu2 %v1517_v13, %s1587_s3 }
0x114d   :  { %v879_v17 = vpop.permute.xlu2 %878 }
0x114e   :  { %v1920_v18 = vadd.f32 %v879_v17, %v871_v15 }
0x1150   :  { %1518 = vtanh.f32 %v1920_v18 }
0x1151   :  { %1520 = vpow2.f32 %v1425_v19 }
0x1155   :  { %v785_v29 = vpop.permute.xlu2 %784 }
0x1156   :  { %v1519_v8 = vpop.eup %1518 }
0x1157   :  { %884 = vrot.lane.b32.xlu0 %v1519_v8, %s1587_s3  ;;  %v1521_v20 = vpop.eup %1520 }
0x1158   :  { %v765_v0 = vadd.f32 1.0, %v1521_v20 }
0x115a   :  { %1522 = vrcp.f32 %v765_v0  ;;  %v777_v25 = vand.u32 2147483648, %v765_v0  ;;  %vm771_vm6 = vweird.f32 %v765_v0  ;;  %v775_v26 = vand.u32 2147483647, %v765_v0 }
0x115c   :  { %v778_v28 = vor.u32 1.1754944e-38, %v777_v25  ;;  %vm776_vm8 = vcmp.eq.f32.partialorder %v775_v26, 8.507059e+37 }
0x1160   :  { %v1523_v2 = vpop.eup %1522 }
0x1161   :  { %v767_v21 = vmul.f32 %v1523_v2, %v765_v0  ;;  %vm772_vm4 = vweird.f32 %v1523_v2 }
0x1162   :  { %vm773_vm7 = vmor %vm771_vm6, %vm772_vm4 }
0x1163   :  { %v768_v22 = vsub.f32 1.0, %v767_v21 }
0x1165   :  { %v769_v5 = vmul.f32 %v1523_v2, %v768_v22 }
0x1167   :  { %v770_v24 = vadd.f32 %v1523_v2, %v769_v5 }
0x1169   :  { %v774_v27 = vsel %vm773_vm7, %v1523_v2, %v770_v24 }
0x116a   :  { %v779_v30 = vsel %vm776_vm8, %v778_v28, %v774_v27 }
0x116b   :  { %v787_v31 = vmul.f32 %v785_v29, %v779_v30  ;;  %v782_v45 = vmul.f32 %v779_v30, %v1849_v38 }
0x11c9   :  { %v885_v23 = vpop.permute.xlu0 %884 }
0x11ca   :  { %v1924_v6 = vmul.f32 %v885_v23, %v868_v10 }
0x11cc   :  { %892 = vrot.lane.b32.xlu1 %v1924_v6, %s1588_s4 }
0x11d4   :  { %789 = vrot.lane.b32.xlu1 %v787_v31, %s1588_s4 }
0x123e   :  { %v893_v32 = vpop.permute.xlu1 %892 }
0x123f   :  { %1428 = vmatmul.msk.f32.vlgmr.msrb.gmra.mxu3 %vm139_vm5, %v893_v32 }
0x1240   :  { %1304 = vmatpush.msrb.mxu3 %v1857_v42 }
0x1242   :  { %1305 = vmatpush.msrb.mxu3 %v1862_v43 }
0x1244   :  { %1306 = vmatpush.msrb.mxu3 %v1872_v47 }
0x1246   :  { %1307 = vmatpush.msrb.mxu3 %v1880_v48  ;;  %v790_v41 = vpop.permute.xlu1 %789 }
0x1247   :  { %v792_v49 = vadd.f32 %v790_v41, %v782_v45 }
0x12c2   :  { %v913_v39 = vpop.f32.mrf.mxu3 }
0x12c3   :  { %v916_v40 = vadd.f32 %v913_v39, %v312_v37 }
0x12c5   :  { %1524 = vtanh.f32 %v916_v40  ;;  %v1429_v7 = vmul.f32 -1.442695, %v916_v40  ;;  %v482_v40 = vadd.f32 %v1910_v51, %v1831_v46 }
0x12c6   :  { %1526 = vtanh.f32 %v792_v49 }
0x12c7   :  { %1528 = vpow2.f32 %v1429_v7 }
0x12cb   :  { %v1525_v52 = vpop.eup %1524 }
0x12cc   :  { %939 = vrot.lane.b32.xlu0 %v1525_v52, %s1587_s3  ;;  %v1527_v33 = vpop.eup %1526 }
0x12cd   :  { %v1529_v53 = vpop.eup %1528 }
0x12ce   :  { %v920_v34 = vadd.f32 1.0, %v1529_v53 }
0x12d0   :  { %1530 = vrcp.f32 %v920_v34  ;;  %v932_v38 = vand.u32 2147483648, %v920_v34  ;;  %vm926_vm10 = vweird.f32 %v920_v34  ;;  %v930_v56 = vand.u32 2147483647, %v920_v34 }
0x12d2   :  { %v933_v59 = vor.u32 1.1754944e-38, %v932_v38  ;;  %vm931_vm12 = vcmp.eq.f32.partialorder %v930_v56, 8.507059e+37 }
0x12d4   :  { %795 = vrot.lane.b32.xlu0 %v1527_v33, %s1587_s3 }
0x12d6   :  { %v1531_v44 = vpop.eup %1530 }
0x12d7   :  { %v922_v35 = vmul.f32 %v1531_v44, %v920_v34  ;;  %vm927_vm9 = vweird.f32 %v1531_v44 }
0x12d8   :  { %vm928_vm11 = vmor %vm926_vm10, %vm927_vm9 }
0x12d9   :  { %v923_v54 = vsub.f32 1.0, %v922_v35 }
0x12db   :  { %v924_v36 = vmul.f32 %v1531_v44, %v923_v54 }
0x12dd   :  { %v925_v55 = vadd.f32 %v1531_v44, %v924_v36 }
0x12df   :  { %v929_v58 = vsel %vm928_vm11, %v1531_v44, %v925_v55 }
0x12e0   :  { %v934_v11 = vsel %vm931_vm12, %v933_v59, %v929_v58 }
0x12e1   :  { %v937_v1 = vmul.f32 %v934_v11, %v1920_v18 }
0x133e   :  { %v940_v60 = vpop.permute.xlu0 %939 }
0x133f   :  { %v942_v61 = vmul.f32 %v940_v60, %v934_v11 }
0x1341   :  { %944 = vrot.lane.b32.xlu2 %v942_v61, %s1588_s4 }
0x1346   :  { %v796_v62 = vpop.permute.xlu0 %795 }
0x1347   :  { %v798_v63 = vmul.f32 %v796_v62, %v779_v30 }
0x1349   :  { %800 = vrot.lane.b32.xlu2 %v798_v63, %s1588_s4 }
0x139b   :  { %v945_v3 = vpop.permute.xlu2 %944 }
0x139c   :  { %v947_v4 = vadd.f32 %v945_v3, %v937_v1 }
0x139e   :  { %1532 = vtanh.f32 %v947_v4 }
0x13a3   :  { %v801_v9 = vpop.permute.xlu2 %800 }
0x13a4   :  { %v1533_v10 = vpop.eup %1532  ;;  %1426 = vmatmul.msk.f32.vlgmr.msrb.gmra.mxu1 %vm139_vm5, %v801_v9 }
0x13a5   :  { %950 = vrot.lane.b32.xlu1 %v1533_v10, %s1587_s3  ;;  %1172 = vmatpush.msrb.mxu1 %v1857_v42  ;;  %v397_v42 = vadd.f32 %v1910_v51, %v1814_v16 }
0x13a7   :  { %1173 = vmatpush.msrb.mxu1 %v1862_v43 }
0x13a9   :  { %1174 = vmatpush.msrb.mxu1 %v1872_v47 }
0x13ab   :  { %1175 = vmatpush.msrb.mxu1 %v1880_v48 }
0x1417   :  { %v951_v12 = vpop.permute.xlu1 %950 }
0x1418   :  { %v1948_v13 = vmul.f32 %v951_v12, %v934_v11 }
0x141a   :  { %958 = vrot.lane.b32.xlu0 %v1948_v13, %s1588_s4 }
0x1421   :  { %v1953_v17 = vpop.f32.mrf.mxu1 }
0x148c   :  { %v959_v15 = vpop.permute.xlu0 %958 }
0x148d   :  { %1430 = vmatmul.msk.f32.vlgmr.msra.gmra.mxu1 %vm139_vm5, %v959_v15 }
0x150a   :  { %v979_v18 = vpop.f32.mrf.mxu1 }
0x150b   :  { %v982_v43 = vadd.f32 %v979_v18, %v397_v42 }
0x150d   :  { %1534 = vtanh.f32 %v982_v43  ;;  %v1431_v48 = vmul.f32 -1.442695, %v982_v43 }
0x150f   :  { %1536 = vpow2.f32 %v1431_v48 }
0x1513   :  { %v1535_v47 = vpop.eup %1534 }
0x1514   :  { %1005 = vrot.lane.b32.xlu1 %v1535_v47, %s1587_s3 }
0x1515   :  { %v1537_v8 = vpop.eup %1536 }
0x1516   :  { %v986_v19 = vadd.f32 1.0, %v1537_v8 }
0x1518   :  { %1538 = vrcp.f32 %v986_v19  ;;  %v998_v5 = vand.u32 2147483648, %v986_v19  ;;  %vm992_vm14 = vweird.f32 %v986_v19  ;;  %v996_v16 = vand.u32 2147483647, %v986_v19 }
0x151a   :  { %v999_v24 = vor.u32 1.1754944e-38, %v998_v5  ;;  %vm997_vm0 = vcmp.eq.f32.partialorder %v996_v16, 8.507059e+37 }
0x151e   :  { %v1539_v20 = vpop.eup %1538 }
0x151f   :  { %v988_v0 = vmul.f32 %v1539_v20, %v986_v19  ;;  %vm993_vm13 = vweird.f32 %v1539_v20 }
0x1520   :  { %vm994_vm15 = vmor %vm992_vm14, %vm993_vm13 }
0x1521   :  { %v989_v2 = vsub.f32 1.0, %v988_v0 }
0x1523   :  { %v990_v21 = vmul.f32 %v1539_v20, %v989_v2 }
0x1525   :  { %v991_v22 = vadd.f32 %v1539_v20, %v990_v21 }
0x1527   :  { %v995_v23 = vsel %vm994_vm15, %v1539_v20, %v991_v22 }
0x1528   :  { %v1000_v26 = vsel %vm997_vm0, %v999_v24, %v995_v23 }
0x1529   :  { %v1003_v28 = vmul.f32 %v1000_v26, %v947_v4  ;;  %v567_v4 = vadd.f32 %v1910_v51, %v1844_v14 }
0x1586   :  { %v1006_v25 = vpop.permute.xlu1 %1005 }
0x1587   :  { %v1008_v27 = vmul.f32 %v1006_v25, %v1000_v26 }
0x1589   :  { %1010 = vrot.lane.b32.xlu2 %v1008_v27, %s1588_s4 }
0x15e3   :  { %v1011_v29 = vpop.permute.xlu2 %1010 }
0x15e4   :  { %v1013_v30 = vadd.f32 %v1011_v29, %v1003_v28  ;;  %v652_v29 = vadd.f32 %v1910_v51, %v1915_v57 }
0x15e6   :  { %1540 = vtanh.f32 %v1013_v30 }
0x15ec   :  { %v1541_v31 = vpop.eup %1540 }
0x15ed   :  { %1016 = vrot.lane.b32.xlu0 %v1541_v31, %s1587_s3 }
0x165f   :  { %v1017_v32 = vpop.permute.xlu0 %1016 }
0x1660   :  { %v1960_v37 = vmul.f32 %v1017_v32, %v1000_v26 }
0x1662   :  { %1024 = vrot.lane.b32.xlu1 %v1960_v37, %s1588_s4 }
0x16d4   :  { %v1025_v39 = vpop.permute.xlu1 %1024 }
0x16d5   :  { %1432 = vmatmul.msk.f32.vlgmr.msra.gmra.mxu2 %vm139_vm5, %v1025_v39 }
0x1758   :  { %v1045_v41 = vpop.f32.mrf.mxu2 }
0x1759   :  { %v1048_v45 = vadd.f32 %v1045_v41, %v482_v40 }
0x175b   :  { %1542 = vtanh.f32 %v1048_v45  ;;  %v1433_v52 = vmul.f32 -1.442695, %v1048_v45 }
0x175d   :  { %1544 = vpow2.f32 %v1433_v52 }
0x1761   :  { %v1543_v49 = vpop.eup %1542 }
0x1762   :  { %1071 = vrot.lane.b32.xlu2 %v1543_v49, %s1587_s3 }
0x1763   :  { %v1545_v33 = vpop.eup %1544 }
0x1764   :  { %v1052_v7 = vadd.f32 1.0, %v1545_v33 }
0x1766   :  { %1546 = vrcp.f32 %v1052_v7  ;;  %v1064_v36 = vand.u32 2147483648, %v1052_v7  ;;  %vm1058_vm2 = vweird.f32 %v1052_v7  ;;  %v1062_v46 = vand.u32 2147483647, %v1052_v7 }
0x1768   :  { %v1065_v38 = vor.u32 1.1754944e-38, %v1064_v36  ;;  %vm1063_vm4 = vcmp.eq.f32.partialorder %v1062_v46, 8.507059e+37 }
0x176c   :  { %v1547_v53 = vpop.eup %1546 }
0x176d   :  { %v1054_v34 = vmul.f32 %v1547_v53, %v1052_v7  ;;  %vm1059_vm1 = vweird.f32 %v1547_v53 }
0x176e   :  { %vm1060_vm3 = vmor %vm1058_vm2, %vm1059_vm1 }
0x176f   :  { %v1055_v44 = vsub.f32 1.0, %v1054_v34 }
0x1771   :  { %v1056_v35 = vmul.f32 %v1547_v53, %v1055_v44 }
0x1773   :  { %v1057_v54 = vadd.f32 %v1547_v53, %v1056_v35 }
0x1775   :  { %v1061_v55 = vsel %vm1060_vm3, %v1547_v53, %v1057_v54 }
0x1776   :  { %v1066_v58 = vsel %vm1063_vm4, %v1065_v38, %v1061_v55 }
0x1777   :  { %v1069_v60 = vmul.f32 %v1066_v58, %v1013_v30 }
0x17bc   :  { %v1072_v56 = vpop.permute.xlu2 %1071 }
0x17bd   :  { %v1074_v59 = vmul.f32 %v1072_v56, %v1066_v58 }
0x17bf   :  { %1076 = vrot.lane.b32.xlu0 %v1074_v59, %s1588_s4 }
0x1831   :  { %v1077_v11 = vpop.permute.xlu0 %1076 }
0x1832   :  { %v1079_v61 = vadd.f32 %v1077_v11, %v1069_v60  ;;  %v737_v11 = vadd.f32 %v1910_v51, %v1905_v50 }
0x1834   :  { %1548 = vtanh.f32 %v1079_v61 }
0x183a   :  { %v1549_v62 = vpop.eup %1548 }
0x183b   :  { %1082 = vrot.lane.b32.xlu1 %v1549_v62, %s1587_s3 }
0x18ad   :  { %v1083_v63 = vpop.permute.xlu1 %1082 }
0x18ae   :  { %v1970_v1 = vmul.f32 %v1083_v63, %v1066_v58 }
0x18b0   :  { %1090 = vrot.lane.b32.xlu2 %v1970_v1, %s1588_s4 }
0x190a   :  { %v1091_v3 = vpop.permute.xlu2 %1090 }
0x190b   :  { %1434 = vmatmul.msk.f32.vlgmr.msra.gmra.mxu3 %vm139_vm5, %v1091_v3 }
0x198e   :  { %v1111_v9 = vpop.f32.mrf.mxu3 }
0x198f   :  { %v1114_v10 = vadd.f32 %v1111_v9, %v567_v4 }
0x1991   :  { %1550 = vtanh.f32 %v1114_v10  ;;  %v1435_v15 = vmul.f32 -1.442695, %v1114_v10 }
0x1993   :  { %1552 = vpow2.f32 %v1435_v15 }
0x1997   :  { %v1551_v12 = vpop.eup %1550 }
0x1998   :  { %1137 = vrot.lane.b32.xlu0 %v1551_v12, %s1587_s3 }
0x1999   :  { %v1553_v42 = vpop.eup %1552 }
0x199a   :  { %v1118_v18 = vadd.f32 1.0, %v1553_v42 }
0x199c   :  { %1554 = vrcp.f32 %v1118_v18  ;;  %v1130_v20 = vand.u32 2147483648, %v1118_v18  ;;  %vm1124_vm7 = vweird.f32 %v1118_v18  ;;  %v1128_v14 = vand.u32 2147483647, %v1118_v18 }
0x199e   :  { %v1131_v2 = vor.u32 1.1754944e-38, %v1130_v20  ;;  %vm1129_vm9 = vcmp.eq.f32.partialorder %v1128_v14, 8.507059e+37 }
0x19a2   :  { %v1555_v43 = vpop.eup %1554 }
0x19a3   :  { %v1120_v47 = vmul.f32 %v1555_v43, %v1118_v18  ;;  %vm1125_vm6 = vweird.f32 %v1555_v43 }
0x19a4   :  { %vm1126_vm8 = vmor %vm1124_vm7, %vm1125_vm6 }
0x19a5   :  { %v1121_v48 = vsub.f32 1.0, %v1120_v47 }
0x19a7   :  { %v1122_v8 = vmul.f32 %v1555_v43, %v1121_v48 }
0x19a9   :  { %v1123_v19 = vadd.f32 %v1555_v43, %v1122_v8 }
0x19ab   :  { %v1127_v0 = vsel %vm1126_vm8, %v1555_v43, %v1123_v19 }
0x19ac   :  { %v1132_v22 = vsel %vm1129_vm9, %v1131_v2, %v1127_v0 }
0x19ad   :  { %v1135_v16 = vmul.f32 %v1132_v22, %v1079_v61 }
0x1a0a   :  { %v1138_v21 = vpop.permute.xlu0 %1137 }
0x1a0b   :  { %v1140_v5 = vmul.f32 %v1138_v21, %v1132_v22 }
0x1a0d   :  { %1142 = vrot.lane.b32.xlu1 %v1140_v5, %s1588_s4 }
0x1a7f   :  { %v1143_v23 = vpop.permute.xlu1 %1142 }
0x1a80   :  { %v1145_v24 = vadd.f32 %v1143_v23, %v1135_v16  ;;  %v37_v23 = vld [vmem:[%s2038_s0] sm:$0xff] }
0x1a82   :  { %1556 = vtanh.f32 %v1145_v24 }
0x1a88   :  { %v1557_v25 = vpop.eup %1556 }
0x1a89   :  { %1148 = vrot.lane.b32.xlu2 %v1557_v25, %s1587_s3  ;;  %v822_v25 = vadd.f32 %v1910_v51, %v1953_v17 }
0x1ae3   :  { %v1149_v26 = vpop.permute.xlu2 %1148 }
0x1ae4   :  { %v1980_v27 = vmul.f32 %v1149_v26, %v1132_v22  ;;  %v1589_v22 = vmov 0  }
0x1ae5   :  { %1448 = vset.pattern.permute.xlu2 %v1589_v22  ;;  %1449 = vset.pattern.permute.xlu0 %v1589_v22 }
0x1ae6   :  { %1156 = vrot.lane.b32.xlu0 %v1980_v27, %s1588_s4 }
0x1b58   :  { %v1157_v28 = vpop.permute.xlu0 %1156 }
0x1b59   :  { %1436 = vmatmul.msk.f32.vlgmr.msrb.gmra.mxu1 %vm139_vm5, %v1157_v28 }
0x1bd6   :  { %v1177_v30 = vpop.f32.mrf.mxu1 }
0x1bd7   :  { %v1180_v31 = vadd.f32 %v1177_v30, %v652_v29 }
0x1bd9   :  { %1558 = vtanh.f32 %v1180_v31  ;;  %v1437_v39 = vmul.f32 -1.442695, %v1180_v31 }
0x1bdb   :  { %1560 = vpow2.f32 %v1437_v39 }
0x1bdf   :  { %v1559_v32 = vpop.eup %1558 }
0x1be0   :  { %1203 = vrot.lane.b32.xlu1 %v1559_v32, %s1587_s3 }
0x1be1   :  { %v1561_v40 = vpop.eup %1560 }
0x1be2   :  { %v1184_v41 = vadd.f32 1.0, %v1561_v40 }
0x1be4   :  { %1562 = vrcp.f32 %v1184_v41  ;;  %v1196_v53 = vand.u32 2147483648, %v1184_v41  ;;  %vm1190_vm11 = vweird.f32 %v1184_v41  ;;  %v1194_v57 = vand.u32 2147483647, %v1184_v41 }
0x1be6   :  { %v1197_v44 = vor.u32 1.1754944e-38, %v1196_v53  ;;  %vm1195_vm13 = vcmp.eq.f32.partialorder %v1194_v57, 8.507059e+37 }
0x1bea   :  { %v1563_v45 = vpop.eup %1562 }
0x1beb   :  { %v1186_v49 = vmul.f32 %v1563_v45, %v1184_v41  ;;  %vm1191_vm10 = vweird.f32 %v1563_v45 }
0x1bec   :  { %vm1192_vm12 = vmor %vm1190_vm11, %vm1191_vm10 }
0x1bed   :  { %v1187_v52 = vsub.f32 1.0, %v1186_v49 }
0x1bef   :  { %v1188_v33 = vmul.f32 %v1563_v45, %v1187_v52 }
0x1bf1   :  { %v1189_v7 = vadd.f32 %v1563_v45, %v1188_v33 }
0x1bf3   :  { %v1193_v34 = vsel %vm1192_vm12, %v1563_v45, %v1189_v7 }
0x1bf4   :  { %v1198_v54 = vsel %vm1195_vm13, %v1197_v44, %v1193_v34  ;;  %v1452_v34 = vld [vmem:[%s2039_s8] ss:$0 sm:$0xff] }
0x1bf5   :  { %v1201_v46 = vmul.f32 %v1198_v54, %v1145_v24 }
0x1c52   :  { %v1204_v35 = vpop.permute.xlu1 %1203 }
0x1c53   :  { %v1206_v36 = vmul.f32 %v1204_v35, %v1198_v54 }
0x1c55   :  { %1208 = vrot.lane.b32.xlu2 %v1206_v36, %s1588_s4 }
0x1caf   :  { %v1209_v55 = vpop.permute.xlu2 %1208 }
0x1cb0   :  { %v1211_v38 = vadd.f32 %v1209_v55, %v1201_v46 }
0x1cb2   :  { %1564 = vtanh.f32 %v1211_v38 }
0x1cb8   :  { %v1565_v56 = vpop.eup %1564 }
0x1cb9   :  { %1214 = vrot.lane.b32.xlu0 %v1565_v56, %s1587_s3 }
0x1d2b   :  { %v1215_v58 = vpop.permute.xlu0 %1214 }
0x1d2c   :  { %v1990_v59 = vmul.f32 %v1215_v58, %v1198_v54 }
0x1d2e   :  { %1222 = vrot.lane.b32.xlu1 %v1990_v59, %s1588_s4 }
0x1da0   :  { %v1223_v60 = vpop.permute.xlu1 %1222 }
0x1da1   :  { %1438 = vmatmul.msk.f32.vlgmr.msrb.gmra.mxu2 %vm139_vm5, %v1223_v60 }
0x1e24   :  { %v1243_v61 = vpop.f32.mrf.mxu2 }
0x1e25   :  { %v1246_v62 = vadd.f32 %v1243_v61, %v737_v11 }
0x1e27   :  { %1566 = vtanh.f32 %v1246_v62  ;;  %v1439_v3 = vmul.f32 -1.442695, %v1246_v62 }
0x1e29   :  { %1568 = vpow2.f32 %v1439_v3 }
0x1e2d   :  { %v1567_v63 = vpop.eup %1566 }
0x1e2e   :  { %1269 = vrot.lane.b32.xlu2 %v1567_v63, %s1587_s3 }
0x1e2f   :  { %v1569_v4 = vpop.eup %1568 }
0x1e30   :  { %v1250_v9 = vadd.f32 1.0, %v1569_v4 }
0x1e32   :  { %1570 = vrcp.f32 %v1250_v9  ;;  %v1262_v43 = vand.u32 2147483648, %v1250_v9  ;;  %vm1256_vm15 = vweird.f32 %v1250_v9  ;;  %v1260_v50 = vand.u32 2147483647, %v1250_v9 }
0x1e34   :  { %v1263_v48 = vor.u32 1.1754944e-38, %v1262_v43  ;;  %vm1261_vm1 = vcmp.eq.f32.partialorder %v1260_v50, 8.507059e+37 }
0x1e38   :  { %v1571_v10 = vpop.eup %1570 }
0x1e39   :  { %v1252_v12 = vmul.f32 %v1571_v10, %v1250_v9  ;;  %vm1257_vm14 = vweird.f32 %v1571_v10 }
0x1e3a   :  { %vm1258_vm0 = vmor %vm1256_vm15, %vm1257_vm14 }
0x1e3b   :  { %v1253_v15 = vsub.f32 1.0, %v1252_v12 }
0x1e3d   :  { %v1254_v42 = vmul.f32 %v1571_v10, %v1253_v15 }
0x1e3f   :  { %v1255_v18 = vadd.f32 %v1571_v10, %v1254_v42 }
0x1e41   :  { %v1259_v47 = vsel %vm1258_vm0, %v1571_v10, %v1255_v18 }
0x1e42   :  { %v1264_v19 = vsel %vm1261_vm1, %v1263_v48, %v1259_v47  ;;  %vm1390_vm1 = vcmask 7168  }
0x1e43   :  { %v1267_v14 = vmul.f32 %v1264_v19, %v1211_v38 }
0x1e88   :  { %v1270_v8 = vpop.permute.xlu2 %1269 }
0x1e89   :  { %v1272_v20 = vmul.f32 %v1270_v8, %v1264_v19 }
0x1e8b   :  { %1274 = vrot.lane.b32.xlu0 %v1272_v20, %s1588_s4 }
0x1efd   :  { %v1275_v0 = vpop.permute.xlu0 %1274 }
0x1efe   :  { %v1277_v2 = vadd.f32 %v1275_v0, %v1267_v14 }
0x1f00   :  { %1572 = vtanh.f32 %v1277_v2 }
0x1f06   :  { %v1573_v21 = vpop.eup %1572 }
0x1f07   :  { %1280 = vrot.lane.b32.xlu1 %v1573_v21, %s1587_s3 }
0x1f79   :  { %v1281_v5 = vpop.permute.xlu1 %1280 }
0x1f7a   :  { %v2000_v16 = vmul.f32 %v1281_v5, %v1264_v19 }
0x1f7c   :  { %1288 = vrot.lane.b32.xlu2 %v2000_v16, %s1588_s4 }
0x1f84   :  { %39 = vperm.xlu2 %1448, %v37_v23  }
0x1fd6   :  { %v1289_v24 = vpop.permute.xlu2 %1288 }
0x1fd7   :  { %1440 = vmatmul.msk.f32.vlgmr.msrb.gmra.mxu3 %vm139_vm5, %v1289_v24 }
0x1fde   :  { %v40_v46 = vpop.permute.xlu2 %39 }
0x1fdf   :  { %vm888_vm7 = vcmp.eq.s32.totalorder %v40_v46, 1  ;;  %vm954_vm8 = vcmp.eq.s32.totalorder %v40_v46, 2  ;;  %vm1020_vm9 = vcmp.eq.s32.totalorder %v40_v46, 3  ;;  %vm1086_vm10 = vcmp.eq.s32.totalorder %v40_v46, 4 }
0x1fe0   :  { %v889_v55 = vsel %vm888_vm7, %v1924_v6, 0.0  ;;  %vm1152_vm11 = vcmp.eq.s32.totalorder %v40_v46, 5  ;;  %vm1218_vm12 = vcmp.eq.s32.totalorder %v40_v46, 6  ;;  %vm1284_vm13 = vcmp.eq.s32.totalorder %v40_v46, 7 }
0x1fe1   :  { %v955_v38 = vsel %vm954_vm8, %v1948_v13, %v889_v55  ;;  %vm1350_vm14 = vcmp.eq.s32.totalorder %v40_v46, 8 }
0x1fe2   :  { %v1021_v56 = vsel %vm1020_vm9, %v1960_v37, %v955_v38  ;;  %v15_v37 = vstv %s2040_s9 }
0x1fe3   :  { %v1087_v58 = vsel %vm1086_vm10, %v1970_v1, %v1021_v56  ;;  %16 = vst [vmem:[#allocation3] sm:$0x1] %v15_v37 }
0x1fe4   :  { %v1153_v60 = vsel %vm1152_vm11, %v1980_v27, %v1087_v58 }
0x1fe5   :  { %v1219_v11 = vsel %vm1218_vm12, %v1990_v59, %v1153_v60 }
0x1fe6   :  { %v1285_v6 = vsel %vm1284_vm13, %v2000_v16, %v1219_v11 }
0x1fea   :  { %v1453_v59 = vld [vmem:[#allocation3] ss:$0 sm:$0xff] }
0x205a   :  { %v1309_v26 = vpop.f32.mrf.mxu3 }
0x205b   :  { %v1312_v28 = vadd.f32 %v1309_v26, %v822_v25 }
0x205d   :  { %1574 = vtanh.f32 %v1312_v28  ;;  %v1441_v30 = vmul.f32 -1.442695, %v1312_v28 }
0x205f   :  { %1576 = vpow2.f32 %v1441_v30 }
0x2063   :  { %v1575_v29 = vpop.eup %1574 }
0x2064   :  { %1335 = vrot.lane.b32.xlu0 %v1575_v29, %s1587_s3 }
0x2065   :  { %v1577_v31 = vpop.eup %1576 }
0x2066   :  { %v1316_v32 = vadd.f32 1.0, %v1577_v31 }
0x2068   :  { %1578 = vrcp.f32 %v1316_v32  ;;  %v1328_v52 = vand.u32 2147483648, %v1316_v32  ;;  %vm1322_vm3 = vweird.f32 %v1316_v32  ;;  %v1326_v51 = vand.u32 2147483647, %v1316_v32 }
0x206a   :  { %v1329_v33 = vor.u32 1.1754944e-38, %v1328_v52  ;;  %vm1327_vm6 = vcmp.eq.f32.partialorder %v1326_v51, 8.507059e+37 }
0x206e   :  { %v1579_v39 = vpop.eup %1578 }
0x206f   :  { %v1318_v40 = vmul.f32 %v1579_v39, %v1316_v32  ;;  %vm1323_vm2 = vweird.f32 %v1579_v39 }
0x2070   :  { %vm1324_vm4 = vmor %vm1322_vm3, %vm1323_vm2 }
0x2071   :  { %v1319_v41 = vsub.f32 1.0, %v1318_v40 }
0x2073   :  { %v1320_v45 = vmul.f32 %v1579_v39, %v1319_v41 }
0x2075   :  { %v1321_v49 = vadd.f32 %v1579_v39, %v1320_v45 }
0x2077   :  { %v1325_v17 = vsel %vm1324_vm4, %v1579_v39, %v1321_v49 }
0x2078   :  { %v1330_v53 = vsel %vm1327_vm6, %v1329_v33, %v1325_v17 }
0x2079   :  { %v1333_v44 = vmul.f32 %v1330_v53, %v1277_v2 }
0x20d6   :  { %v1336_v7 = vpop.permute.xlu0 %1335 }
0x20d7   :  { %v1338_v57 = vmul.f32 %v1336_v7, %v1330_v53 }
0x20d9   :  { %1340 = vrot.lane.b32.xlu1 %v1338_v57, %s1588_s4 }
0x20e1   :  { %1355 = vrot.lane.b32.xlu1 %v1452_v34, %s1590_s17 }
0x214b   :  { %v1341_v35 = vpop.permute.xlu1 %1340 }
0x214c   :  { %v1343_v54 = vadd.f32 %v1341_v35, %v1333_v44 }
0x214e   :  { %1580 = vtanh.f32 %v1343_v54 }
0x2153   :  { %v1356_v63 = vpop.permute.xlu1 %1355 }
0x2154   :  { %v1581_v36 = vpop.eup %1580 }
0x2155   :  { %1346 = vrot.lane.b32.xlu0 %v1581_v36, %s1587_s3 }
0x21c7   :  { %v1347_v61 = vpop.permute.xlu0 %1346 }
0x21c8   :  { %v1349_v62 = vmul.f32 %v1347_v61, %v1330_v53 }
0x21ca   :  { %v1351_v13 = vsel %vm1350_vm14, %v1349_v62, %v1285_v6 }
0x21cb   :  { %v1358_v3 = vmul.f32 %v1356_v63, %v1351_v13 }
0x21cd   :  { %1360 = vrot.lane.b32.xlu2 %v1358_v3, %s1588_s4 }
0x2227   :  { %v1361_v1 = vpop.permute.xlu2 %1360 }
0x2228   :  { %v1363_v27 = vsel %vm139_vm5, %v1361_v1, 0.0 }
0x2229   :  { %1364 = vadd.xlane.f32.xlu0 %v1363_v27 }
0x229c   :  { %v1365_v4 = vpop.xlane.xlu0 %1364 }
0x229d   :  { %v1370_v9 = vadd.f32 %v1453_v59, %v1365_v4 }
0x229f   :  { %v1442_v10 = vmul.f32 -1.442695, %v1370_v9 }
0x22a1   :  { %1582 = vpow2.f32 %v1442_v10 }
0x22a7   :  { %v1583_v12 = vpop.eup %1582 }
0x22a8   :  { %v1374_v15 = vadd.f32 1.0, %v1583_v12 }
0x22aa   :  { %1584 = vrcp.f32 %v1374_v15  ;;  %v1386_v50 = vand.u32 2147483648, %v1374_v15  ;;  %v1384_v48 = vand.u32 2147483647, %v1374_v15  ;;  %vm1380_vm0 = vweird.f32 %v1374_v15 }
0x22ac   :  { %v1387_v19 = vor.u32 1.1754944e-38, %v1386_v50  ;;  %vm1385_vm2 = vcmp.eq.f32.partialorder %v1384_v48, 8.507059e+37 }
0x22b0   :  { %v1585_v42 = vpop.eup %1584 }
0x22b1   :  { %v1376_v18 = vmul.f32 %v1585_v42, %v1374_v15  ;;  %vm1381_vm15 = vweird.f32 %v1585_v42 }
0x22b2   :  { %vm1382_vm5 = vmor %vm1380_vm0, %vm1381_vm15 }
0x22b3   :  { %v1377_v43 = vsub.f32 1.0, %v1376_v18 }
0x22b5   :  { %v1378_v47 = vmul.f32 %v1585_v42, %v1377_v43 }
0x22b7   :  { %v1379_v8 = vadd.f32 %v1585_v42, %v1378_v47 }
0x22b9   :  { %v1383_v20 = vsel %vm1382_vm5, %v1585_v42, %v1379_v8 }
0x22ba   :  { %v1388_v14 = vsel %vm1385_vm2, %v1387_v19, %v1383_v20 }
0x22bb   :  { %1391 = vst.msk [vmem:[%s2041_s10] sm:$0xff] %vm1390_vm1, %v1388_v14 }

</bundles_post_ra>
